<compile_context>
chip_gen: v7x
topology: tpu7x:2x2x1
jax: 0.10.0
libtpu: 0.0.40
codegen_flags: <defaults>
</compile_context>

<pallas_src>
import functools

import jax
import jax.numpy as jnp
from jax.experimental import pallas as pl
from jax.experimental.pallas import tpu as pltpu

LANE = 128
SUBLANE = 8


def _round_up(n, m):
    return ((n + m - 1) // m) * m


def _pad2d(a, rows, cols):
    r, c = a.shape
    return jnp.pad(a, ((0, rows - r), (0, cols - c)))


def mlp_softmax_kernel(x_ref, w1_ref, b1_ref, w2_ref, b2_ref, w3_ref, b3_ref,
                       *rest, out_valid, use_dropout):
    if use_dropout:
        m1_ref, m2_ref, o_ref = rest
    else:
        (o_ref,) = rest

    prec = jax.lax.Precision.HIGHEST
    x = x_ref[...]

    # Layer 1: Linear -> ReLU (-> Dropout)
    h = jnp.dot(x, w1_ref[...], preferred_element_type=jnp.float32,
                precision=prec) + b1_ref[...]
    h = jnp.maximum(h, 0.0)
    if use_dropout:
        h = h * m1_ref[...]          # mask pre-scaled by 1/(1-p): one VPU multiply

    # Layer 2: Linear -> ReLU (-> Dropout)
    h = jnp.dot(h, w2_ref[...], preferred_element_type=jnp.float32,
                precision=prec) + b2_ref[...]
    h = jnp.maximum(h, 0.0)
    if use_dropout:
        h = h * m2_ref[...]

    # Layer 3: Linear head
    y = jnp.dot(h, w3_ref[...], preferred_element_type=jnp.float32,
                precision=prec) + b3_ref[...]

    # Fused softmax over the valid output columns (padded lanes -> -inf -> exp()=0).
    if out_valid < y.shape[-1]:
        col = jax.lax.broadcasted_iota(jnp.int32, y.shape, dimension=1)
        y = jnp.where(col < out_valid, y, -jnp.inf)
    m = jnp.max(y, axis=-1, keepdims=True)
    e = jnp.exp(y - m)
    s = jnp.sum(e, axis=-1, keepdims=True)
    o_ref[...] = (e / s).astype(o_ref.dtype)


def softmax_net_forward(x, params, *, dropout_p, training, rng_key=None, tb_max=512):
    """Fused forward pass of Softmax(NonLinearNet(x)).

    x: (B, in_shape) float32
    params: dict with w1 (in,h), b1 (1,h), w2 (h,h), b2 (1,h), w3 (h,out), b3 (1,out)
            (weights stored transposed vs. PyTorch so y = x @ W + b).
    """
    B, IN = x.shape
    H = params["w1"].shape[1]
    OUT = params["w3"].shape[1]

    # Lane-dense padded feature dims.
    IN_P = _round_up(IN, LANE)
    H_P = _round_up(H, LANE)
    OUT_P = _round_up(OUT, LANE)

    # Large batch tile; whole batch in one grid step at small sizes.
    tb = min(_round_up(B, SUBLANE), tb_max)
    B_P = _round_up(B, tb)
    grid = (B_P // tb,)

    x_p = _pad2d(x.astype(jnp.float32), B_P, IN_P)
    w1 = _pad2d(params["w1"], IN_P, H_P)
    b1 = _pad2d(params["b1"], 1, H_P)
    w2 = _pad2d(params["w2"], H_P, H_P)
    b2 = _pad2d(params["b2"], 1, H_P)
    w3 = _pad2d(params["w3"], H_P, OUT_P)
    b3 = _pad2d(params["b3"], 1, OUT_P)

    use_dropout = bool(training) and float(dropout_p) > 0.0

    operands = [x_p, w1, b1, w2, b2, w3, b3]
    in_specs = [
        pl.BlockSpec((tb, IN_P), lambda i: (i, 0)),     # x (batch-tiled)
        pl.BlockSpec((IN_P, H_P), lambda i: (0, 0)),    # w1 (resident)
        pl.BlockSpec((1, H_P), lambda i: (0, 0)),       # b1
        pl.BlockSpec((H_P, H_P), lambda i: (0, 0)),     # w2
        pl.BlockSpec((1, H_P), lambda i: (0, 0)),       # b2
        pl.BlockSpec((H_P, OUT_P), lambda i: (0, 0)),   # w3
        pl.BlockSpec((1, OUT_P), lambda i: (0, 0)),     # b3
    ]

    if use_dropout:
        if rng_key is None:
            rng_key = jax.random.PRNGKey(0)
        keep = 1.0 - float(dropout_p)
        k1, k2 = jax.random.split(rng_key)
        m1 = jax.random.bernoulli(k1, keep, (B_P, H_P)).astype(jnp.float32) * (1.0 / keep)
        m2 = jax.random.bernoulli(k2, keep, (B_P, H_P)).astype(jnp.float32) * (1.0 / keep)
        operands += [m1, m2]
        in_specs += [pl.BlockSpec((tb, H_P), lambda i: (i, 0)),
                     pl.BlockSpec((tb, H_P), lambda i: (i, 0))]

    kernel = functools.partial(mlp_softmax_kernel, out_valid=OUT,
                               use_dropout=use_dropout)

    out = pl.pallas_call(
        kernel,
        out_shape=jax.ShapeDtypeStruct((B_P, OUT_P), jnp.float32),
        grid=grid,
        in_specs=in_specs,
        out_specs=pl.BlockSpec((tb, OUT_P), lambda i: (i, 0)),
        compiler_params=pltpu.CompilerParams(
            dimension_semantics=("parallel",)),   # batch tiles are independent
    )(*operands)

    return out[:B, :OUT]


def init_params(key, in_shape, hidden_size, out_shape):
    """Deterministic PyTorch-style (uniform +/- 1/sqrt(fan_in)) initialization."""
    def linear(k, fan_in, fan_out):
        kw, kb = jax.random.split(k)
        bound = float(fan_in) ** -0.5
        w = jax.random.uniform(kw, (fan_in, fan_out), jnp.float32, -bound, bound)
        b = jax.random.uniform(kb, (1, fan_out), jnp.float32, -bound, bound)
        return w, b

    k1, k2, k3 = jax.random.split(key, 3)
    w1, b1 = linear(k1, in_shape, hidden_size)
    w2, b2 = linear(k2, hidden_size, hidden_size)
    w3, b3 = linear(k3, hidden_size, out_shape)
    return {"w1": w1, "b1": b1, "w2": w2, "b2": b2, "w3": w3, "b3": b3}


def reference_eval(x, p):
    """Pure-JAX reference (eval mode: dropout = identity), Softmax(dim=1)."""
    prec = jax.lax.Precision.HIGHEST
    h = jnp.maximum(jnp.dot(x, p["w1"], precision=prec) + p["b1"], 0.0)
    h = jnp.maximum(jnp.dot(h, p["w2"], precision=prec) + p["b2"], 0.0)
    y = jnp.dot(h, p["w3"], precision=prec) + p["b3"]
    return jax.nn.softmax(y, axis=1)


if __name__ == "__main__":
    IN_SHAPE, HIDDEN, OUT_SHAPE = 32, 64, 16
    BATCH = 16
    DROPOUT_P = 0.1

    key = jax.random.PRNGKey(0)
    kx, kp, kd = jax.random.split(key, 3)
    x = jax.random.normal(kx, (BATCH, IN_SHAPE), dtype=jnp.float32)
    params = init_params(kp, IN_SHAPE, HIDDEN, OUT_SHAPE)

    # Eval mode (dropout disabled) — check against pure-JAX reference.
    y_eval = softmax_net_forward(x, params, dropout_p=DROPOUT_P, training=False)
    y_eval = jax.block_until_ready(y_eval)
    y_ref = reference_eval(x, params)
    assert y_eval.shape == (BATCH, OUT_SHAPE)
    assert jnp.allclose(y_eval, y_ref, atol=1e-4, rtol=1e-3), "eval-mode mismatch"
    assert jnp.allclose(jnp.sum(y_eval, axis=1), 1.0, atol=1e-4), "softmax rows must sum to 1"

    # Train mode (inverted dropout via host-generated masks, fused in-kernel apply).
    y_train = softmax_net_forward(x, params, dropout_p=DROPOUT_P, training=True,
                                  rng_key=kd)
    y_train = jax.block_until_ready(y_train)
    assert y_train.shape == (BATCH, OUT_SHAPE)
    assert jnp.allclose(jnp.sum(y_train, axis=1), 1.0, atol=1e-4)

    print("KERNEL_OK")
</pallas_src>

<mosaic_0001>
module attributes {stable_mosaic.version = 11 : i64} {
  func.func @mlp_softmax_kernel(%arg0: i32, %arg1: memref<16x128xf32, #tpu.memory_space<vmem>>, %arg2: memref<128x128xf32, #tpu.memory_space<vmem>>, %arg3: memref<1x128xf32, #tpu.memory_space<vmem>>, %arg4: memref<128x128xf32, #tpu.memory_space<vmem>>, %arg5: memref<1x128xf32, #tpu.memory_space<vmem>>, %arg6: memref<128x128xf32, #tpu.memory_space<vmem>>, %arg7: memref<1x128xf32, #tpu.memory_space<vmem>>, %arg8: memref<16x128xf32, #tpu.memory_space<vmem>>) attributes {dimension_semantics = [#tpu.dimension_semantics<parallel>], iteration_bounds = array<i64: 1>, scalar_prefetch = 0 : i64, scratch_operands = 0 : i64, tpu.core_type = #tpu.core_type<tc>, window_params = [{transform_indices = @transform_0, window_bounds = array<i64: 16, 128>}, {pipeline_mode = #tpu.pipeline_mode<synchronous>, transform_indices = @transform_1, window_bounds = array<i64: 128, 128>}, {pipeline_mode = #tpu.pipeline_mode<synchronous>, transform_indices = @transform_2, window_bounds = array<i64: 1, 128>}, {pipeline_mode = #tpu.pipeline_mode<synchronous>, transform_indices = @transform_3, window_bounds = array<i64: 128, 128>}, {pipeline_mode = #tpu.pipeline_mode<synchronous>, transform_indices = @transform_4, window_bounds = array<i64: 1, 128>}, {pipeline_mode = #tpu.pipeline_mode<synchronous>, transform_indices = @transform_5, window_bounds = array<i64: 128, 128>}, {pipeline_mode = #tpu.pipeline_mode<synchronous>, transform_indices = @transform_6, window_bounds = array<i64: 1, 128>}, {transform_indices = @transform_7, window_bounds = array<i64: 16, 128>}]} {
    %c0 = arith.constant 0 : index
    %c0_0 = arith.constant 0 : index
    %0 = vector.load %arg1[%c0, %c0_0] : memref<16x128xf32, #tpu.memory_space<vmem>>, vector<16x128xf32>
    %c0_1 = arith.constant 0 : index
    %c0_2 = arith.constant 0 : index
    %1 = vector.load %arg2[%c0_1, %c0_2] : memref<128x128xf32, #tpu.memory_space<vmem>>, vector<128x128xf32>
    %cst = arith.constant dense<0.000000e+00> : vector<16x128xf32>
    %2 = tpu.matmul %0, %1, %cst {dimension_numbers = #tpu.dot_dimension_numbers<[1], [0], [0], [1], [0, 0, 1, 1], [], []>, precision = #tpu.contract_precision<fp32>} : vector<16x128xf32>, vector<128x128xf32>, vector<16x128xf32> -> vector<16x128xf32>
    %c0_3 = arith.constant 0 : index
    %c0_4 = arith.constant 0 : index
    %3 = vector.load %arg3[%c0_3, %c0_4] : memref<1x128xf32, #tpu.memory_space<vmem>>, vector<1x128xf32>
    %4 = vector.broadcast %3 : vector<1x128xf32> to vector<16x128xf32>
    %5 = arith.addf %2, %4 : vector<16x128xf32>
    %cst_5 = arith.constant 0.000000e+00 : f32
    %6 = vector.broadcast %cst_5 : f32 to vector<16x128xf32>
    %7 = arith.maximumf %5, %6 : vector<16x128xf32>
    %c0_6 = arith.constant 0 : index
    %c0_7 = arith.constant 0 : index
    %8 = vector.load %arg4[%c0_6, %c0_7] : memref<128x128xf32, #tpu.memory_space<vmem>>, vector<128x128xf32>
    %cst_8 = arith.constant dense<0.000000e+00> : vector<16x128xf32>
    %9 = tpu.matmul %7, %8, %cst_8 {dimension_numbers = #tpu.dot_dimension_numbers<[1], [0], [0], [1], [0, 0, 1, 1], [], []>, precision = #tpu.contract_precision<fp32>} : vector<16x128xf32>, vector<128x128xf32>, vector<16x128xf32> -> vector<16x128xf32>
    %c0_9 = arith.constant 0 : index
    %c0_10 = arith.constant 0 : index
    %10 = vector.load %arg5[%c0_9, %c0_10] : memref<1x128xf32, #tpu.memory_space<vmem>>, vector<1x128xf32>
    %11 = vector.broadcast %10 : vector<1x128xf32> to vector<16x128xf32>
    %12 = arith.addf %9, %11 : vector<16x128xf32>
    %cst_11 = arith.constant 0.000000e+00 : f32
    %13 = vector.broadcast %cst_11 : f32 to vector<16x128xf32>
    %14 = arith.maximumf %12, %13 : vector<16x128xf32>
    %c0_12 = arith.constant 0 : index
    %c0_13 = arith.constant 0 : index
    %15 = vector.load %arg6[%c0_12, %c0_13] : memref<128x128xf32, #tpu.memory_space<vmem>>, vector<128x128xf32>
    %cst_14 = arith.constant dense<0.000000e+00> : vector<16x128xf32>
    %16 = tpu.matmul %14, %15, %cst_14 {dimension_numbers = #tpu.dot_dimension_numbers<[1], [0], [0], [1], [0, 0, 1, 1], [], []>, precision = #tpu.contract_precision<fp32>} : vector<16x128xf32>, vector<128x128xf32>, vector<16x128xf32> -> vector<16x128xf32>
    %c0_15 = arith.constant 0 : index
    %c0_16 = arith.constant 0 : index
    %17 = vector.load %arg7[%c0_15, %c0_16] : memref<1x128xf32, #tpu.memory_space<vmem>>, vector<1x128xf32>
    %18 = vector.broadcast %17 : vector<1x128xf32> to vector<16x128xf32>
    %19 = arith.addf %16, %18 : vector<16x128xf32>
    %20 = tpu.iota {dimensions = array<i32: 1>} : vector<16x128xi32>
    %c16_i32 = arith.constant 16 : i32
    %21 = vector.broadcast %c16_i32 : i32 to vector<16x128xi32>
    %22 = arith.cmpi slt, %20, %21 : vector<16x128xi32>
    %cst_17 = arith.constant 0xFF800000 : f32
    %23 = vector.broadcast %cst_17 : f32 to vector<16x128xf32>
    %24 = arith.select %22, %19, %23 : vector<16x128xi1>, vector<16x128xf32>
    %cst_18 = arith.constant dense<0xFF800000> : vector<16xf32>
    %25 = vector.multi_reduction <maximumf>, %24, %cst_18 [1] : vector<16x128xf32> to vector<16xf32>
    %26 = vector.shape_cast %25 : vector<16xf32> to vector<16x1xf32>
    %27 = vector.broadcast %26 : vector<16x1xf32> to vector<16x128xf32>
    %28 = arith.subf %24, %27 : vector<16x128xf32>
    %29 = math.exp %28 : vector<16x128xf32>
    %cst_19 = arith.constant dense<0.000000e+00> : vector<16xf32>
    %30 = vector.multi_reduction <add>, %29, %cst_19 [1] : vector<16x128xf32> to vector<16xf32>
    %31 = vector.shape_cast %30 : vector<16xf32> to vector<16x1xf32>
    %32 = vector.broadcast %31 : vector<16x1xf32> to vector<16x128xf32>
    %33 = arith.divf %29, %32 : vector<16x128xf32>
    %c0_20 = arith.constant 0 : index
    %c0_21 = arith.constant 0 : index
    %34 = vector.load %arg8[%c0_20, %c0_21] : memref<16x128xf32, #tpu.memory_space<vmem>>, vector<16x128xf32>
    tpu.vector_store %arg8[%c0_20, %c0_21], %33 {strides = array<i32>} : memref<16x128xf32, #tpu.memory_space<vmem>>, vector<16x128xf32>,
    return
  }
  func.func @transform_0(%arg0: i32) -> (i32, i32) {
    %c0_i32 = arith.constant 0 : i32
    %c0_i32_0 = arith.constant 0 : i32
    return %arg0, %c0_i32 : i32, i32
  }
  func.func @transform_1(%arg0: i32) -> (i32, i32) {
    %c0_i32 = arith.constant 0 : i32
    %c0_i32_0 = arith.constant 0 : i32
    %c0_i32_1 = arith.constant 0 : i32
    return %c0_i32, %c0_i32_0 : i32, i32
  }
  func.func @transform_2(%arg0: i32) -> (i32, i32) {
    %c0_i32 = arith.constant 0 : i32
    %c0_i32_0 = arith.constant 0 : i32
    %c0_i32_1 = arith.constant 0 : i32
    return %c0_i32, %c0_i32_0 : i32, i32
  }
  func.func @transform_3(%arg0: i32) -> (i32, i32) {
    %c0_i32 = arith.constant 0 : i32
    %c0_i32_0 = arith.constant 0 : i32
    %c0_i32_1 = arith.constant 0 : i32
    return %c0_i32, %c0_i32_0 : i32, i32
  }
  func.func @transform_4(%arg0: i32) -> (i32, i32) {
    %c0_i32 = arith.constant 0 : i32
    %c0_i32_0 = arith.constant 0 : i32
    %c0_i32_1 = arith.constant 0 : i32
    return %c0_i32, %c0_i32_0 : i32, i32
  }
  func.func @transform_5(%arg0: i32) -> (i32, i32) {
    %c0_i32 = arith.constant 0 : i32
    %c0_i32_0 = arith.constant 0 : i32
    %c0_i32_1 = arith.constant 0 : i32
    return %c0_i32, %c0_i32_0 : i32, i32
  }
  func.func @transform_6(%arg0: i32) -> (i32, i32) {
    %c0_i32 = arith.constant 0 : i32
    %c0_i32_0 = arith.constant 0 : i32
    %c0_i32_1 = arith.constant 0 : i32
    return %c0_i32, %c0_i32_0 : i32, i32
  }
  func.func @transform_7(%arg0: i32) -> (i32, i32) {
    %c0_i32 = arith.constant 0 : i32
    %c0_i32_0 = arith.constant 0 : i32
    return %arg0, %c0_i32 : i32, i32
  }
}

</mosaic_0001>

<bundles_post_ra>
// kernel: tpu_custom_call.1
= control target key start
LH: loop header
LB: loop body
LE: loop exit
PB: predicated region body
PF: predicated region fallthrough
CT: control target
= control target key end

     0   :  { %12 = vsyncpa [#allocation3], 0  ;;  %s5030_s0 = inlined_call_operand.hbm [shape: f32[16,128], index: 0, kind: input, shape index: {}]   ;;  %s5031_s1 = inlined_call_operand.hbm [shape: f32[128,128], index: 1, kind: input, shape index: {}]   ;;  %s5032_s2 = inlined_call_operand.vmem [shape: f32[1,128], index: 2, kind: input, shape index: {}]   ;;  %s5033_s3 = inlined_call_operand.hbm [shape: f32[128,128], index: 3, kind: input, shape index: {}]   ;;  %s5034_s4 = inlined_call_operand.vmem [shape: f32[1,128], index: 4, kind: input, shape index: {}]   ;;  %s5035_s5 = inlined_call_operand.hbm [shape: f32[128,128], index: 5, kind: input, shape index: {}]   ;;  %s5036_s6 = inlined_call_operand.vmem [shape: f32[1,128], index: 6, kind: input, shape index: {}]   ;;  %s5037_s7 = inlined_call_operand.hbm [shape: f32[16,128], index: 7, kind: output, shape index: {}]  }
   0x1   :  { %13 = vsyncpa [#allocation6], 0 }
   0x2   :  { %14 = vsyncpa [#allocation9], 0 }
   0x3   :  { %15 = vsyncpa [#allocation4], 0  ;;  %s3955_s24 = smov [#allocation5]   ;;  %s3956_s26 = smov [#allocation2]  }
   0x4   :  { %s33_s25 = sshll.u32 %s3955_s24, 4  ;;  %s21_s27 = sshll.u32 %s3956_s26, 4  ;;  %s34_s25 = int_to_ptr.vmem [resolvable:$true] %s33_s25  ;;  %s4002_s27 = int_to_ptr.vmem [resolvable:$true] %s21_s27 }
   0x5   :  { %s3837_s30 = scalar_lea.hbm %s5031_s1, 2048 }
   0x6   :  { %p3838_p0 = scmp.ne.s32.totalorder %s5031_s1, %s3837_s30  ;;  %p3841_p1 = scmp.lt.u32.totalorder %s3837_s30, %s5031_s1 }
   0x8   :  { %p3843_p2 = pnand %p3841_p1, %p3838_p0 }
   0xa   :  { %3846 = shalt.err (!%p3843_p2)
}
   0xb   :  { %s3847_s12 = scalar_lea.vmem %s34_s25, 2048  ;;  %p3852_p4 = scmp.lt.s32.totalorder %s34_s25, %s34_s25 }
   0xc   :  { %p3848_p3 = scmp.ne.s32.totalorder %s34_s25, %s3847_s12  ;;  %p3853_p5 = scmp.lt.s32.totalorder %s3847_s12, %s3847_s12 }
   0xe   :  { %p3854_p6 = por %p3853_p5, %p3852_p4 }
  0x10   :  { %p3855_p7 = pnand %p3854_p6, %p3848_p3 }
  0x12   :  { %3858 = shalt.err (!%p3855_p7)
}
  0x13   :  { %s3957_s13 = smov 128   ;;  %s3958_s14 = smov 8  }
  0x14   :  { %39 = dma.hbm_to_vmem [thread:$0]  %s5031_s1, 2048, %s34_s25, [#allocation6], %s3957_s13, %s3957_s13, %s3958_s14  }
  0x15   :  { %s3859_s19 = scalar_lea.hbm %s5030_s0, 256 }
  0x16   :  { %p3860_p8 = scmp.ne.s32.totalorder %s5030_s0, %s3859_s19  ;;  %p3863_p9 = scmp.lt.u32.totalorder %s3859_s19, %s5030_s0 }
  0x18   :  { %p3865_p10 = pnand %p3863_p9, %p3860_p8 }
  0x1a   :  { %3868 = shalt.err (!%p3865_p10)
}
  0x1b   :  { %s3869_s24 = scalar_lea.vmem %s4002_s27, 256  ;;  %p3874_p12 = scmp.lt.s32.totalorder %s4002_s27, %s4002_s27 }
  0x1c   :  { %p3870_p11 = scmp.ne.s32.totalorder %s4002_s27, %s3869_s24  ;;  %p3875_p13 = scmp.lt.s32.totalorder %s3869_s24, %s3869_s24 }
  0x1e   :  { %p3876_p0 = por %p3875_p13, %p3874_p12 }
  0x20   :  { %p3877_p1 = pnand %p3876_p0, %p3870_p11 }
  0x22   :  { %3880 = shalt.err (!%p3877_p1)
}
  0x23   :  { %27 = dma.hbm_to_vmem [thread:$0]  %s5030_s0, 256, %s4002_s27, [#allocation3], %s3957_s13, %s3957_s13, %s3958_s14  }
  0x24   :  { %s3959_s26 = smov [#allocation7]   ;;  %s3960_s29 = smov [#allocation8]  }
  0x25   :  { %s47_s28 = sshll.u32 %s3959_s26, 4  ;;  %s61_s30 = sshll.u32 %s3960_s29, 4  ;;  %s48_s28 = int_to_ptr.vmem [resolvable:$true] %s47_s28  ;;  %s4039_s30 = int_to_ptr.vmem [resolvable:$true] %s61_s30 }
  0x26   :  { %s3881_s10 = scalar_lea.hbm %s5033_s3, 2048 }
  0x27   :  { %p3882_p2 = scmp.ne.s32.totalorder %s5033_s3, %s3881_s10  ;;  %p3885_p3 = scmp.lt.u32.totalorder %s3881_s10, %s5033_s3 }
  0x29   :  { %p3887_p4 = pnand %p3885_p3, %p3882_p2 }
  0x2b   :  { %3890 = shalt.err (!%p3887_p4)
}
  0x2c   :  { %s3891_s0 = scalar_lea.vmem %s48_s28, 2048  ;;  %p3896_p6 = scmp.lt.s32.totalorder %s48_s28, %s48_s28 }
  0x2d   :  { %p3892_p5 = scmp.ne.s32.totalorder %s48_s28, %s3891_s0  ;;  %p3897_p7 = scmp.lt.s32.totalorder %s3891_s0, %s3891_s0 }
  0x2f   :  { %p3898_p8 = por %p3897_p7, %p3896_p6 }
  0x31   :  { %p3899_p9 = pnand %p3898_p8, %p3892_p5 }
  0x33   :  { %3902 = shalt.err (!%p3899_p9)
}
  0x34   :  { %53 = dma.hbm_to_vmem [thread:$0]  %s5033_s3, 2048, %s48_s28, [#allocation6], %s3957_s13, %s3957_s13, %s3958_s14  }
  0x35   :  { %s3903_s20 = scalar_lea.hbm %s5035_s5, 2048 }
  0x36   :  { %p3904_p10 = scmp.ne.s32.totalorder %s5035_s5, %s3903_s20  ;;  %p3907_p11 = scmp.lt.u32.totalorder %s3903_s20, %s5035_s5 }
  0x38   :  { %p3909_p12 = pnand %p3907_p11, %p3904_p10 }
  0x3a   :  { %3912 = shalt.err (!%p3909_p12)
}
  0x3b   :  { %s3913_s1 = scalar_lea.vmem %s4039_s30, 2048  ;;  %p3918_p0 = scmp.lt.s32.totalorder %s4039_s30, %s4039_s30 }
  0x3c   :  { %p3914_p13 = scmp.ne.s32.totalorder %s4039_s30, %s3913_s1  ;;  %p3919_p1 = scmp.lt.s32.totalorder %s3913_s1, %s3913_s1 }
  0x3e   :  { %p3920_p2 = por %p3919_p1, %p3918_p0 }
  0x40   :  { %p3921_p3 = pnand %p3920_p2, %p3914_p13 }
  0x42   :  { %3924 = shalt.err (!%p3921_p3)
}
  0x43   :  { %67 = dma.hbm_to_vmem [thread:$0]  %s5035_s5, 2048, %s4039_s30, [#allocation9], %s3957_s13, %s3957_s13, %s3958_s14  }
  0x44   :  { %3947 = dma.done.wait [#allocation3], 256  }
  0x45   :  { %3948 = vsyncadd [#allocation3], 4294967040 }
  0x46   :  { %3949 = dma.done.wait [#allocation6], 4096  }
  0x47   :  { %3950 = vsyncadd [#allocation6], 4294963200 }
  0x48   :  { %3951 = dma.done.wait [#allocation9], 2048  }
  0x49   :  { %3952 = vsyncadd [#allocation9], 4294965248  ;;  %v84_v0 = vld [vmem:[#allocation5] sm:$0xff]  ;;  %v85_v1 = vld [vmem:[#allocation5 + $0x8] sm:$0xff] }
  0x4a   :  { %v86_v2 = vld [vmem:[#allocation5 + $0x10] sm:$0xff]  ;;  %v108_v3 = vand.u32 4294901760, %v84_v0  ;;  %v111_v4 = vand.u32 4294901760, %v85_v1  ;;  %v4076_v5 = vld [vmem:[#allocation5 + $0x18] sm:$0xff]  ;;  %v4078_v7 = vld [vmem:[#allocation5 + $0x20] sm:$0xff] }
  0x4b   :  { %v114_v6 = vand.u32 4294901760, %v86_v2  ;;  %v4080_v8 = vld [vmem:[#allocation5 + $0x28] sm:$0xff]  ;;  %v117_v9 = vand.u32 4294901760, %v4076_v5  ;;  %v120_v11 = vand.u32 4294901760, %v4078_v7  ;;  %v4089_v14 = vld [vmem:[#allocation5 + $0x30] sm:$0xff]  ;;  %v4091_v15 = vld [vmem:[#allocation5 + $0x38] sm:$0xff] }
  0x4c   :  { %v4083_v10 = vpack.c.bf16 %v111_v4, %v108_v3  ;;  %v123_v12 = vand.u32 4294901760, %v4080_v8  ;;  %v82_v16 = vld [vmem:[#allocation2] sm:$0xff]  ;;  %v126_v19 = vand.u32 4294901760, %v4089_v14  ;;  %v129_v20 = vand.u32 4294901760, %v4091_v15  ;;  %v4109_v21 = vld [vmem:[#allocation5 + $0x40] sm:$0xff]  ;;  %v4111_v22 = vld [vmem:[#allocation5 + $0x48] sm:$0xff] }
  0x4d   :  { %v4087_v13 = vpack.c.bf16 %v117_v9, %v114_v6  ;;  %v4097_v17 = vand.u32 4294901760, %v82_v16  ;;  %v132_v26 = vand.u32 4294901760, %v4109_v21  ;;  %v135_v27 = vand.u32 4294901760, %v4111_v22  ;;  %v4129_v28 = vld [vmem:[#allocation5 + $0x50] sm:$0xff]  ;;  %v4131_v29 = vld [vmem:[#allocation5 + $0x58] sm:$0xff]  ;;  %v4146_v36 = vld [vmem:[#allocation5 + $0x60] sm:$0xff] }
  0x4e   :  { %3211 = vmatprep.subr.bf16.mxu1 %v4083_v10  ;;  %3307 = vmatprep.subr.bf16.mxu0 %v4083_v10  ;;  %v4105_v18 = vpack.c.bf16 %v123_v12, %v120_v11  ;;  %v4125_v25 = vpack.c.bf16 %v129_v20, %v126_v19  ;;  %v138_v31 = vand.u32 4294901760, %v4129_v28  ;;  %v83_v33 = vld [vmem:[#allocation2 + $0x8] sm:$0xff]  ;;  %v141_v35 = vand.u32 4294901760, %v4131_v29  ;;  %v4148_v37 = vld [vmem:[#allocation5 + $0x68] sm:$0xff]  ;;  %v4160_v43 = vld [vmem:[#allocation5 + $0x70] sm:$0xff] }
  0x4f   :  { %3213 = vmatpush3.bf16.msra.mxu1 %v4083_v10  ;;  %3309 = vmatpush3.bf16.msra.mxu0 %v4083_v10  ;;  %v4114_v23 = vsub.f32 %v82_v16, %v4097_v17  ;;  %v4143_v34 = vpack.c.bf16 %v135_v27, %v132_v26  ;;  %v4150_v38 = vsub.f32 %v84_v0, %v108_v3  ;;  %v4154_v40 = vand.u32 4294901760, %v83_v33  ;;  %v4162_v44 = vld [vmem:[#allocation5 + $0x78] sm:$0xff] }
  0x50   :  { %3215 = vmatprep.subr.bf16.mxu1 %v4087_v13  ;;  %3311 = vmatprep.subr.bf16.mxu0 %v4087_v13  ;;  %v4152_v39 = vsub.f32 %v85_v1, %v111_v4  ;;  %v144_v41 = vand.u32 4294901760, %v4146_v36  ;;  %v147_v42 = vand.u32 4294901760, %v4148_v37  ;;  %v4164_v45 = vsub.f32 %v86_v2, %v114_v6 }
  0x51   :  { %v190_v24 = vand.u32 4294901760, %v4114_v23  ;;  %v4172_v46 = vpack.c.bf16 %v141_v35, %v138_v31  ;;  %v211_v47 = vand.u32 4294901760, %v4150_v38  ;;  %v4177_v49 = vsub.f32 %v4076_v5, %v117_v9 }
  0x52   :  { %v218_v48 = vand.u32 4294901760, %v4152_v39  ;;  %v150_v50 = vand.u32 4294901760, %v4160_v43  ;;  %v153_v51 = vand.u32 4294901760, %v4162_v44  ;;  %v4182_v52 = vsub.f32 %v83_v33, %v4154_v40 }
  0x53   :  { %3217 = vmatpush3.bf16.msra.mxu1 %v4087_v13  ;;  %3313 = vmatpush3.bf16.msra.mxu0 %v4087_v13  ;;  %v191_v30 = vsub.f32 %v4114_v23, %v190_v24  ;;  %v4190_v53 = vpack.c.bf16 %v147_v42, %v144_v41  ;;  %v225_v54 = vand.u32 4294901760, %v4164_v45  ;;  %v4196_v55 = vsub.f32 %v4078_v7, %v120_v11 }
  0x54   :  { %3219 = vmatprep.subr.bf16.mxu1 %v4105_v18  ;;  %3315 = vmatprep.subr.bf16.mxu0 %v4105_v18  ;;  %v212_v56 = vsub.f32 %v4150_v38, %v211_v47  ;;  %v219_v57 = vsub.f32 %v4152_v39, %v218_v48  ;;  %v232_v58 = vand.u32 4294901760, %v4177_v49  ;;  %v4206_v59 = vsub.f32 %v4080_v8, %v123_v12 }
  0x55   :  { %2717 = vmatprep.mubr.f32.mxu0 %v190_v24  ;;  %v192_v32 = vand.u32 4294901760, %v191_v30  ;;  %v4212_v60 = vpack.c.bf16 %v153_v51, %v150_v50  ;;  %v200_v61 = vand.u32 4294901760, %v4182_v52  ;;  %v226_v62 = vsub.f32 %v4164_v45, %v225_v54 }
  0x56   :  { %v239_v63 = vand.u32 4294901760, %v4196_v55  ;;  %v4222_v0 = vsub.f32 %v4089_v14, %v126_v19  ;;  %v4227_v1 = vsub.f32 %v4091_v15, %v129_v20  ;;  %v213_v2 = vand.u32 4294901760, %v212_v56 }
  0x57   :  { %3221 = vmatpush3.bf16.msra.mxu1 %v4105_v18  ;;  %3317 = vmatpush3.bf16.msra.mxu0 %v4105_v18  ;;  %v220_v3 = vand.u32 4294901760, %v219_v57  ;;  %v233_v4 = vsub.f32 %v4177_v49, %v232_v58  ;;  %v246_v5 = vand.u32 4294901760, %v4206_v59  ;;  %v3338_v6 = vpack.c.bf16 %v218_v48, %v211_v47 }
  0x58   :  { %3223 = vmatprep.subr.bf16.mxu1 %v4125_v25  ;;  %3319 = vmatprep.subr.bf16.mxu0 %v4125_v25  ;;  %v201_v7 = vsub.f32 %v4182_v52, %v200_v61  ;;  %v4237_v8 = vsub.f32 %v4109_v21, %v132_v26  ;;  %v227_v9 = vand.u32 4294901760, %v226_v62  ;;  %v240_v11 = vsub.f32 %v4196_v55, %v239_v63 }
  0x59   :  { %2612 = vmatprep.mubr.f32.mxu1 %v192_v32  ;;  %v253_v12 = vand.u32 4294901760, %v4222_v0  ;;  %v260_v14 = vand.u32 4294901760, %v4227_v1  ;;  %v3242_v15 = vpack.c.bf16 %v220_v3, %v213_v2  ;;  %v234_v16 = vand.u32 4294901760, %v233_v4 }
  0x5a   :  { %v247_v19 = vsub.f32 %v4206_v59, %v246_v5  ;;  %v4250_v20 = vsub.f32 %v4111_v22, %v135_v27  ;;  %v202_v21 = vand.u32 4294901760, %v201_v7  ;;  %v3342_v24 = vpack.c.bf16 %v232_v58, %v225_v54 }
  0x5b   :  { %3225 = vmatpush3.bf16.msra.mxu1 %v4125_v25  ;;  %3321 = vmatpush3.bf16.msra.mxu0 %v4125_v25  ;;  %v267_v26 = vand.u32 4294901760, %v4237_v8  ;;  %v4256_v30 = vsub.f32 %v4129_v28, %v138_v31  ;;  %v254_v32 = vsub.f32 %v4222_v0, %v253_v12  ;;  %v261_v33 = vsub.f32 %v4227_v1, %v260_v14 }
  0x5c   :  { %3227 = vmatprep.subr.bf16.mxu1 %v4143_v34  ;;  %3323 = vmatprep.subr.bf16.mxu0 %v4143_v34  ;;  %v4265_v22 = vsub.f32 %v4131_v29, %v141_v35  ;;  %v3246_v27 = vpack.c.bf16 %v234_v16, %v227_v9  ;;  %v241_v47 = vand.u32 4294901760, %v240_v11  ;;  %v248_v48 = vand.u32 4294901760, %v247_v19 }
  0x5d   :  { %v274_v28 = vand.u32 4294901760, %v4250_v20  ;;  %v3346_v31 = vpack.c.bf16 %v246_v5, %v239_v63  ;;  %v268_v54 = vsub.f32 %v4237_v8, %v267_v26  ;;  %v4272_v56 = vsub.f32 %v4146_v36, %v144_v41 }
  0x5e   :  { %v255_v29 = vand.u32 4294901760, %v254_v32  ;;  %v262_v35 = vand.u32 4294901760, %v261_v33  ;;  %v281_v57 = vand.u32 4294901760, %v4256_v30  ;;  %v288_v58 = vand.u32 4294901760, %v4265_v22 }
  0x5f   :  { %3229 = vmatpush3.bf16.msra.mxu1 %v4143_v34  ;;  %3325 = vmatpush3.bf16.msra.mxu0 %v4143_v34  ;;  %v3250_v62 = vpack.c.bf16 %v248_v48, %v241_v47  ;;  %v4280_v63 = vsub.f32 %v4148_v37, %v147_v42  ;;  %v3350_v36 = vpack.c.bf16 %v260_v14, %v253_v12  ;;  %v269_v41 = vand.u32 4294901760, %v268_v54 }
  0x60   :  { %3231 = vmatprep.subr.bf16.mxu1 %v4172_v46  ;;  %3327 = vmatprep.subr.bf16.mxu0 %v4172_v46  ;;  %v3254_v2 = vpack.c.bf16 %v262_v35, %v255_v29  ;;  %v282_v3 = vsub.f32 %v4256_v30, %v281_v57  ;;  %v289_v4 = vsub.f32 %v4265_v22, %v288_v58  ;;  %v295_v5 = vand.u32 4294901760, %v4272_v56 }
  0x61   :  { %v302_v37 = vand.u32 4294901760, %v4280_v63  ;;  %v4291_v42 = vsub.f32 %v4160_v43, %v150_v50  ;;  %v4296_v7 = vsub.f32 %v4162_v44, %v153_v51  ;;  %v3354_v9 = vpack.c.bf16 %v274_v28, %v267_v26 }
  0x62   :  { %v283_v11 = vand.u32 4294901760, %v282_v3  ;;  %v290_v12 = vand.u32 4294901760, %v289_v4  ;;  %v296_v14 = vsub.f32 %v4272_v56, %v295_v5  ;;  %v3358_v51 = vpack.c.bf16 %v288_v58, %v281_v57  ;;  %v802_v57 = vld [vmem:[#allocation7 + $0x48] sm:$0xff]  ;;  %v805_v4 = vld [vmem:[#allocation7 + $0x60] sm:$0xff] }
  0x63   :  { %3233 = vmatpush3.bf16.msra.mxu1 %v4172_v46  ;;  %3329 = vmatpush3.bf16.msra.mxu0 %v4172_v46  ;;  %v303_v16 = vsub.f32 %v4280_v63, %v302_v37  ;;  %v309_v43 = vand.u32 4294901760, %v4291_v42  ;;  %v316_v50 = vand.u32 4294901760, %v4296_v7  ;;  %v3362_v33 = vpack.c.bf16 %v302_v37, %v295_v5  ;;  %v806_v5 = vld [vmem:[#allocation7 + $0x68] sm:$0xff] }
  0x64   :  { %3235 = vmatprep.subr.bf16.mxu1 %v4190_v53  ;;  %3331 = vmatprep.subr.bf16.mxu0 %v4190_v53  ;;  %v3262_v44 = vpack.c.bf16 %v290_v12, %v283_v11  ;;  %v297_v19 = vand.u32 4294901760, %v296_v14  ;;  %v3278_v54 = vpack.c.bf16 %v4177_v49, %v4164_v45  ;;  %v856_v37 = vand.u32 4294901760, %v806_v5  ;;  %v807_v11 = vld [vmem:[#allocation7 + $0x70] sm:$0xff]  ;;  %v808_v12 = vld [vmem:[#allocation7 + $0x78] sm:$0xff] }
  0x65   :  { %v317_v26 = vsub.f32 %v4296_v7, %v316_v50  ;;  %v859_v14 = vand.u32 4294901760, %v807_v11 }
  0x67   :  { %3237 = vmatpush3.bf16.msra.mxu1 %v4190_v53  ;;  %3333 = vmatpush3.bf16.msra.mxu0 %v4190_v53  ;;  %v318_v47 = vand.u32 4294901760, %v317_v26 }
  0x68   :  { %3239 = vmatprep.subr.bf16.mxu1 %v4212_v60  ;;  %3335 = vmatprep.subr.bf16.mxu0 %v4212_v60 }
  0x6b   :  { %3241 = vmatpush3.bf16.msra.mxu1 %v4212_v60  ;;  %3337 = vmatpush3.bf16.msra.mxu0 %v4212_v60 }
  0x6c   :  { %3243 = vmatprep.subr.bf16.mxu1 %v3242_v15  ;;  %3339 = vmatprep.subr.bf16.mxu0 %v3338_v6 }
  0x6e   :  { %2613 = vmatmul.mubr.f32.vlgmr.msra.gmra.mrb[0].mxu1 %v202_v21  ;;  %2718 = vmatmul.mubr.f32.vlgmr.msra.gmra.mrb[0].mxu0 %v200_v61  ;;  %v275_v61 = vsub.f32 %v4250_v20, %v274_v28  ;;  %v304_v21 = vand.u32 4294901760, %v303_v16  ;;  %v3366_v28 = vpack.c.bf16 %v316_v50, %v309_v43 }
  0x6f   :  { %3245 = vmatpush3.bf16.msra.mxu1 %v3242_v15  ;;  %3341 = vmatpush3.bf16.msra.mxu0 %v3338_v6 }
  0x70   :  { %3247 = vmatprep.subr.bf16.mxu1 %v3246_v27  ;;  %3343 = vmatprep.subr.bf16.mxu0 %v3342_v24  ;;  %v276_v6 = vand.u32 4294901760, %v275_v61  ;;  %v3266_v32 = vpack.c.bf16 %v304_v21, %v297_v19 }
  0x71   :  { %2647 = vmatprep.mubr.f32.mxu1 %v4097_v17  ;;  %2752 = vmatprep.mubr.f32.mxu0 %v4097_v17 }
  0x72   :  { %v3258_v15 = vpack.c.bf16 %v276_v6, %v269_v41  ;;  %v853_v6 = vand.u32 4294901760, %v805_v4 }
  0x73   :  { %3249 = vmatpush3.bf16.msra.mxu1 %v3246_v27  ;;  %3345 = vmatpush3.bf16.msra.mxu0 %v3342_v24  ;;  %v310_v24 = vsub.f32 %v4291_v42, %v309_v43 }
  0x74   :  { %3251 = vmatprep.subr.bf16.mxu1 %v3250_v62  ;;  %3347 = vmatprep.subr.bf16.mxu0 %v3346_v31 }
  0x75   :  { %v311_v27 = vand.u32 4294901760, %v310_v24 }
  0x77   :  { %3253 = vmatpush3.bf16.msra.mxu1 %v3250_v62  ;;  %3349 = vmatpush3.bf16.msra.mxu0 %v3346_v31  ;;  %v3270_v48 = vpack.c.bf16 %v318_v47, %v311_v27  ;;  %v3274_v31 = vpack.c.bf16 %v4152_v39, %v4150_v38  ;;  %v3282_v38 = vpack.c.bf16 %v4206_v59, %v4196_v55  ;;  %v4339_v55 = vld [vmem:[#allocation7 + $0x18] sm:$0xff]  ;;  %v844_v62 = vand.u32 4294901760, %v802_v57 }
  0x78   :  { %3255 = vmatprep.subr.bf16.mxu1 %v3254_v2  ;;  %3351 = vmatprep.subr.bf16.mxu0 %v3350_v36  ;;  %v3286_v39 = vpack.c.bf16 %v4227_v1, %v4222_v0  ;;  %v826_v0 = vand.u32 4294901760, %v4339_v55  ;;  %v4347_v1 = vld [vmem:[#allocation7 + $0x20] sm:$0xff] }
  0x7b   :  { %3257 = vmatpush3.bf16.msra.mxu1 %v3254_v2  ;;  %3353 = vmatpush3.bf16.msra.mxu0 %v3350_v36  ;;  %v804_v36 = vld [vmem:[#allocation7 + $0x58] sm:$0xff] }
  0x7c   :  { %3259 = vmatprep.subr.bf16.mxu1 %v3258_v15  ;;  %3355 = vmatprep.subr.bf16.mxu0 %v3354_v9  ;;  %v850_v2 = vand.u32 4294901760, %v804_v36 }
  0x7f   :  { %3261 = vmatpush3.bf16.msra.mxu1 %v3258_v15  ;;  %3357 = vmatpush3.bf16.msra.mxu0 %v3354_v9  ;;  %v862_v15 = vand.u32 4294901760, %v808_v12 }
  0x80   :  { %3263 = vmatprep.subr.bf16.mxu1 %v3262_v44  ;;  %3359 = vmatprep.subr.bf16.mxu0 %v3358_v51 }
  0x81   :  { %v4406_v50 = vpack.c.bf16 %v862_v15, %v859_v14 }
  0x83   :  { %3265 = vmatpush3.bf16.msra.mxu1 %v3262_v44  ;;  %3361 = vmatpush3.bf16.msra.mxu0 %v3358_v51 }
  0x84   :  { %3267 = vmatprep.subr.bf16.mxu1 %v3266_v32  ;;  %3363 = vmatprep.subr.bf16.mxu0 %v3362_v33 }
  0x87   :  { %3269 = vmatpush3.bf16.msra.mxu1 %v3266_v32  ;;  %3365 = vmatpush3.bf16.msra.mxu0 %v3362_v33  ;;  %v4421_v32 = vsub.f32 %v802_v57, %v844_v62 }
  0x88   :  { %3271 = vmatprep.subr.bf16.mxu1 %v3270_v48  ;;  %3367 = vmatprep.subr.bf16.mxu0 %v3366_v28 }
  0x89   :  { %v983_v27 = vand.u32 4294901760, %v4421_v32 }
  0x8b   :  { %3273 = vmatpush3.bf16.msra.mxu1 %v3270_v48  ;;  %3369 = vmatpush3.bf16.msra.mxu0 %v3366_v28  ;;  %v984_v48 = vsub.f32 %v4421_v32, %v983_v27 }
  0x8c   :  { %3275 = vmatprep.subr.bf16.mxu1 %v3274_v31  ;;  %3371 = vmatprep.subr.bf16.mxu0 %v4083_v10 }
  0x8e   :  { %2648 = vmatmul.mubr.f32.vlgmr.msra.gmra.mrb[0].mxu1 %v4154_v40  ;;  %2753 = vmatmul.mubr.f32.vlgmr.msra.gmra.mrb[0].mxu0 %v4154_v40 }
  0x8f   :  { %3277 = vmatpush3.bf16.msra.mxu1 %v3274_v31  ;;  %3373 = vmatpush3.bf16.msra.mxu0 %v4083_v10  ;;  %v3290_v10 = vpack.c.bf16 %v4250_v20, %v4237_v8  ;;  %v4349_v8 = vld [vmem:[#allocation7 + $0x28] sm:$0xff]  ;;  %v829_v20 = vand.u32 4294901760, %v4347_v1  ;;  %v4433_v31 = vsub.f32 %v804_v36, %v850_v2  ;;  %v4458_v36 = vsub.f32 %v808_v12, %v862_v15 }
  0x90   :  { %3279 = vmatprep.subr.bf16.mxu1 %v3278_v54  ;;  %3375 = vmatprep.subr.bf16.mxu0 %v4087_v13 }
  0x91   :  { %2682 = vmatprep.mubr.f32.mxu1 %v4114_v23  ;;  %2787 = vmatprep.mubr.f32.mxu0 %v4097_v17  ;;  %v3298_v17 = vpack.c.bf16 %v4280_v63, %v4272_v56  ;;  %v794_v23 = vld [vmem:[#allocation7 + $0x8] sm:$0xff]  ;;  %v4363_v56 = vld [vmem:[#allocation7 + $0x38] sm:$0xff]  ;;  %v803_v63 = vld [vmem:[#allocation7 + $0x50] sm:$0xff] }
  0x92   :  { %v820_v49 = vand.u32 4294901760, %v794_v23  ;;  %v838_v35 = vand.u32 4294901760, %v4363_v56  ;;  %v847_v41 = vand.u32 4294901760, %v803_v63 }
  0x93   :  { %3281 = vmatpush3.bf16.msra.mxu1 %v3278_v54  ;;  %3377 = vmatpush3.bf16.msra.mxu0 %v4087_v13  ;;  %v3294_v13 = vpack.c.bf16 %v4265_v22, %v4256_v30  ;;  %v832_v30 = vand.u32 4294901760, %v4349_v8  ;;  %v4361_v22 = vld [vmem:[#allocation7 + $0x30] sm:$0xff] }
  0x94   :  { %3283 = vmatprep.subr.bf16.mxu1 %v3282_v38  ;;  %3379 = vmatprep.subr.bf16.mxu0 %v4105_v18  ;;  %v835_v29 = vand.u32 4294901760, %v4361_v22  ;;  %v4392_v3 = vpack.c.bf16 %v850_v2, %v847_v41  ;;  %v4400_v9 = vsub.f32 %v794_v23, %v820_v49  ;;  %v4431_v28 = vsub.f32 %v803_v63, %v847_v41 }
  0x95   :  { %v4445_v23 = vsub.f32 %v805_v4, %v853_v6  ;;  %v4456_v63 = vsub.f32 %v807_v11, %v859_v14 }
  0x96   :  { %v927_v43 = vand.u32 4294901760, %v4400_v9 }
  0x97   :  { %3285 = vmatpush3.bf16.msra.mxu1 %v3282_v38  ;;  %3381 = vmatpush3.bf16.msra.mxu0 %v4105_v18  ;;  %v793_v18 = vld [vmem:[#allocation7] sm:$0xff]  ;;  %v985_v38 = vand.u32 4294901760, %v984_v48  ;;  %v5039_v4 = vand.u32 4294901760, %v4456_v63  ;;  %v4493_v48 = vpack.c.bf16 %v4458_v36, %v4456_v63 }
  0x98   :  { %3287 = vmatprep.subr.bf16.mxu1 %v3286_v39  ;;  %3383 = vmatprep.subr.bf16.mxu0 %v4125_v25  ;;  %v817_v45 = vand.u32 4294901760, %v793_v18  ;;  %v928_v51 = vsub.f32 %v4400_v9, %v927_v43 }
  0x9a   :  { %v4343_v59 = vpack.c.bf16 %v820_v49, %v817_v45  ;;  %v929_v21 = vand.u32 4294901760, %v928_v51 }
  0x9b   :  { %3289 = vmatpush3.bf16.msra.mxu1 %v3286_v39  ;;  %3385 = vmatpush3.bf16.msra.mxu0 %v4125_v25  ;;  %v3302_v25 = vpack.c.bf16 %v4296_v7, %v4291_v42  ;;  %v4396_v42 = vpack.c.bf16 %v856_v37, %v853_v6  ;;  %v4398_v7 = vsub.f32 %v793_v18, %v817_v45  ;;  %v990_v39 = vand.u32 4294901760, %v4431_v28 }
  0x9c   :  { %3291 = vmatprep.subr.bf16.mxu1 %v3290_v10  ;;  %3387 = vmatprep.subr.bf16.mxu0 %v4143_v34 }
  0x9d   :  { %v920_v16 = vand.u32 4294901760, %v4398_v7  ;;  %v4477_v51 = vpack.c.bf16 %v4400_v9, %v4398_v7 }
  0x9f   :  { %3293 = vmatpush3.bf16.msra.mxu1 %v3290_v10  ;;  %3389 = vmatpush3.bf16.msra.mxu0 %v4143_v34  ;;  %v4337_v34 = vld [vmem:[#allocation7 + $0x10] sm:$0xff]  ;;  %v921_v44 = vsub.f32 %v4398_v7, %v920_v16  ;;  %v5042_v10 = vand.u32 4294901760, %v4433_v31 }
  0xa0   :  { %3295 = vmatprep.subr.bf16.mxu1 %v3294_v13  ;;  %3391 = vmatprep.subr.bf16.mxu0 %v4172_v46 }
  0xa1   :  { %v922_v19 = vand.u32 4294901760, %v921_v44  ;;  %v998_v18 = vsub.f32 %v4433_v31, %v5042_v10 }
  0xa3   :  { %3297 = vmatpush3.bf16.msra.mxu1 %v3294_v13  ;;  %3393 = vmatpush3.bf16.msra.mxu0 %v4172_v46  ;;  %v823_v46 = vand.u32 4294901760, %v4337_v34  ;;  %v4416_v24 = vpack.c.bf16 %v929_v21, %v922_v19  ;;  %v999_v49 = vand.u32 4294901760, %v998_v18  ;;  %v4485_v21 = vpack.c.bf16 %v4433_v31, %v4431_v28 }
  0xa4   :  { %3299 = vmatprep.subr.bf16.mxu1 %v3298_v17  ;;  %3395 = vmatprep.subr.bf16.mxu0 %v4190_v53 }
  0xa5   :  { %v4501_v18 = vsub.f32 %v4337_v34, %v823_v46  ;;  %v4513_v34 = vsub.f32 %v4347_v1, %v829_v20 }
  0xa7   :  { %3301 = vmatpush3.bf16.msra.mxu1 %v3298_v17  ;;  %3397 = vmatpush3.bf16.msra.mxu0 %v4190_v53  ;;  %v4357_v53 = vpack.c.bf16 %v826_v0, %v823_v46  ;;  %v991_v17 = vsub.f32 %v4431_v28, %v990_v39  ;;  %v1513_v28 = vld [vmem:[#allocation8 + $0x58] sm:$0xff] }
  0xa8   :  { %3303 = vmatprep.subr.bf16.mxu1 %v3302_v25  ;;  %3399 = vmatprep.subr.bf16.mxu0 %v4212_v60 }
  0xa9   :  { %v992_v45 = vand.u32 4294901760, %v991_v17 }
  0xab   :  { %3305 = vmatpush3.bf16.msra.mxu1 %v3302_v25  ;;  %3401 = vmatpush3.bf16.msra.mxu0 %v4212_v60  ;;  %v4373_v60 = vpack.c.bf16 %v832_v30, %v829_v20  ;;  %v4447_v25 = vsub.f32 %v806_v5, %v856_v37  ;;  %v5038_v5 = vand.u32 4294901760, %v4458_v36  ;;  %v1019_v37 = vsub.f32 %v4456_v63, %v5039_v4 }
  0xac   :  { %3403 = vmatprep.subr.bf16.mxu1 %v4343_v59  ;;  %v948_v20 = vand.u32 4294901760, %v4513_v34 }
  0xad   :  { %v5040_v57 = vand.u32 4294901760, %v4447_v25  ;;  %v1026_v11 = vsub.f32 %v4458_v36, %v5038_v5  ;;  %v1020_v14 = vand.u32 4294901760, %v1019_v37 }
  0xae   :  { %2683 = vmatmul.mubr.f32.vlgmr.msra.gmra.mrb[0].mxu1 %v4182_v52  ;;  %2788 = vmatmul.mubr.f32.vlgmr.msra.gmra.mrb[0].mxu0 %v4154_v40  ;;  %v4383_v40 = vpack.c.bf16 %v838_v35, %v835_v29  ;;  %v801_v52 = vld [vmem:[#allocation7 + $0x40] sm:$0xff] }
  0xaf   :  { %3405 = vmatpush3.bf16.msra.mxu1 %v4343_v59  ;;  %v841_v58 = vand.u32 4294901760, %v801_v52  ;;  %v1012_v41 = vsub.f32 %v4447_v25, %v5040_v57  ;;  %v1027_v15 = vand.u32 4294901760, %v1026_v11  ;;  %v934_v11 = vand.u32 4294901760, %v4501_v18 }
  0xb0   :  { %3407 = vmatprep.subr.bf16.mxu1 %v4357_v53 }
  0xb1   :  { %v4388_v61 = vpack.c.bf16 %v844_v62, %v841_v58  ;;  %v4419_v26 = vsub.f32 %v801_v52, %v841_v58  ;;  %v5041_v52 = vand.u32 4294901760, %v4445_v23  ;;  %v4451_v58 = vpack.c.bf16 %v999_v49, %v992_v45 }
  0xb2   :  { %v1013_v6 = vand.u32 4294901760, %v1012_v41  ;;  %v4473_v44 = vpack.c.bf16 %v1027_v15, %v1020_v14  ;;  %v4506_v45 = vsub.f32 %v4339_v55, %v826_v0  ;;  %v4518_v55 = vsub.f32 %v4349_v8, %v832_v30 }
  0xb3   :  { %3409 = vmatpush3.bf16.msra.mxu1 %v4357_v53  ;;  %v976_v33 = vand.u32 4294901760, %v4419_v26  ;;  %v1005_v62 = vsub.f32 %v4445_v23, %v5041_v52  ;;  %v4481_v19 = vpack.c.bf16 %v4421_v32, %v4419_v26  ;;  %v4538_v30 = vsub.f32 %v4361_v22, %v835_v29 }
  0xb4   :  { %3411 = vmatprep.subr.bf16.mxu1 %v4373_v60  ;;  %v941_v14 = vand.u32 4294901760, %v4506_v45  ;;  %v955_v8 = vand.u32 4294901760, %v4518_v55  ;;  %v5055_v32 = vand.u32 4294901760, %v4458_v36 }
  0xb5   :  { %v977_v47 = vsub.f32 %v4419_v26, %v976_v33  ;;  %v1006_v2 = vand.u32 4294901760, %v1005_v62  ;;  %v962_v29 = vand.u32 4294901760, %v4538_v30  ;;  %v5054_v26 = vand.u32 4294901760, %v4456_v63 }
  0xb6   :  { %v942_v1 = vsub.f32 %v4506_v45, %v941_v14  ;;  %v3538_v7 = vpack.c.bf16 %v955_v8, %v948_v20 }
  0xb7   :  { %3413 = vmatpush3.bf16.msra.mxu1 %v4373_v60  ;;  %v978_v54 = vand.u32 4294901760, %v977_v47  ;;  %v4471_v12 = vpack.c.bf16 %v1013_v6, %v1006_v2  ;;  %v4489_v47 = vpack.c.bf16 %v4447_v25, %v4445_v23  ;;  %v963_v52 = vsub.f32 %v4538_v30, %v962_v29 }
  0xb8   :  { %3415 = vmatprep.subr.bf16.mxu1 %v4383_v40 }
  0xb9   :  { %v4437_v13 = vpack.c.bf16 %v985_v38, %v978_v54  ;;  %v2253_v54 = vld [vmem:[%s5032_s2] ss:$0 sm:$0xff] }
  0xbb   :  { %3417 = vmatpush3.bf16.msra.mxu1 %v4383_v40 }
  0xbc   :  { %3419 = vmatprep.subr.bf16.mxu1 %v4388_v61 }
  0xbf   :  { %3421 = vmatpush3.bf16.msra.mxu1 %v4388_v61 }
  0xc0   :  { %3423 = vmatprep.subr.bf16.mxu1 %v4392_v3 }
  0xc3   :  { %3425 = vmatpush3.bf16.msra.mxu1 %v4392_v3 }
  0xc4   :  { %3427 = vmatprep.subr.bf16.mxu1 %v4396_v42 }
  0xc7   :  { %3429 = vmatpush3.bf16.msra.mxu1 %v4396_v42 }
  0xc8   :  { %3431 = vmatprep.subr.bf16.mxu1 %v4406_v50 }
  0xcb   :  { %3433 = vmatpush3.bf16.msra.mxu1 %v4406_v50 }
  0xcc   :  { %3435 = vmatprep.subr.bf16.mxu1 %v4416_v24 }
 0x181   :  { %v2684_v38 = vpop.f32.mrb[0].mxu1  ;;  %v2789_v17 = vpop.f32.mrb[0].mxu0 }
 0x182   :  { %v3786_v49 = vadd.f32 %v2684_v38, %v2253_v54  ;;  %v465_v62 = vpop.f32.mrb[1].mxu1  ;;  %v781_v41 = vpop.f32.mrb[1].mxu0  ;;  %v935_v38 = vsub.f32 %v4501_v18, %v934_v11 }
 0x183   :  { %v3788_v2 = vadd.f32 %v2253_v54, %v465_v62 }
 0x184   :  { %v3787_v6 = vadd.f32 %v3786_v49, %v2789_v17  ;;  %v4543_v49 = vsub.f32 %v4363_v56, %v838_v35  ;;  %v956_v56 = vsub.f32 %v4518_v55, %v955_v8 }
 0x185   :  { %v3789_v37 = vadd.f32 %v3788_v2, %v781_v41 }
 0x186   :  { %v792_v46 = vmax.f32 %v3787_v6, 0.0  ;;  %v936_v6 = vand.u32 4294901760, %v935_v38  ;;  %v969_v35 = vand.u32 4294901760, %v4543_v49  ;;  %v957_v57 = vand.u32 4294901760, %v956_v56 }
 0x187   :  { %v791_v0 = vmax.f32 %v3789_v37, 0.0  ;;  %v943_v37 = vand.u32 4294901760, %v942_v1 }
 0x188   :  { %v4520_v15 = vand.u32 4294901760, %v792_v46  ;;  %v970_v10 = vsub.f32 %v4543_v49, %v969_v35  ;;  %v3542_v9 = vpack.c.bf16 %v969_v35, %v962_v29 }
 0x189   :  { %v4522_v54 = vand.u32 4294901760, %v791_v0  ;;  %v3438_v1 = vpack.c.bf16 %v943_v37, %v936_v6  ;;  %v964_v6 = vand.u32 4294901760, %v963_v52  ;;  %v4588_v52 = vld [vmem:[#allocation8 + $0x10] sm:$0xff] }
 0x18a   :  { %v4532_v17 = vsub.f32 %v792_v46, %v4520_v15  ;;  %v949_v46 = vsub.f32 %v4513_v34, %v948_v20  ;;  %v971_v37 = vand.u32 4294901760, %v970_v10  ;;  %v4584_v10 = vld [vmem:[#allocation8] sm:$0xff] }
 0x18b   :  { %v4546_v62 = vsub.f32 %v791_v0, %v4522_v54 }
 0x18c   :  { %v909_v41 = vand.u32 4294901760, %v4532_v17  ;;  %v950_v5 = vand.u32 4294901760, %v949_v46  ;;  %v3446_v46 = vpack.c.bf16 %v971_v37, %v964_v6  ;;  %v4618_v6 = vld [vmem:[#allocation8 + $0x30] sm:$0xff]  ;;  %v4620_v37 = vld [vmem:[#allocation8 + $0x38] sm:$0xff] }
 0x18d   :  { %v899_v2 = vand.u32 4294901760, %v4546_v62 }
 0x18e   :  { %v910_v22 = vsub.f32 %v4532_v17, %v909_v41 }
 0x18f   :  { %v900_v0 = vsub.f32 %v4546_v62, %v899_v2 }
 0x190   :  { %v911_v4 = vand.u32 4294901760, %v910_v22  ;;  %v3474_v22 = vpack.c.bf16 %v4518_v55, %v4513_v34  ;;  %v1516_v34 = vld [vmem:[#allocation8 + $0x70] sm:$0xff]  ;;  %v1517_v55 = vld [vmem:[#allocation8 + $0x78] sm:$0xff] }
 0x191   :  { %v901_v38 = vand.u32 4294901760, %v900_v0  ;;  %v3442_v0 = vpack.c.bf16 %v957_v57, %v950_v5  ;;  %v1526_v57 = vand.u32 4294901760, %v4584_v10  ;;  %v5044_v5 = vand.u32 4294901760, %v4588_v52 }
 0x193   :  { %2822 = vmatprep.mubr.f32.mxu1 %v901_v38  ;;  %v4740_v36 = vsub.f32 %v4584_v10, %v1526_v57 }
 0x194   :  { %2823 = vmatmul.mubr.f32.vlgmr.msra.gmra.mrb[2].mxu1 %v911_v4  ;;  %v4594_v4 = vld [vmem:[#allocation8 + $0x18] sm:$0xff] }
 0x195   :  { %3437 = vmatpush3.bf16.msra.mxu1 %v4416_v24  ;;  %2857 = vmatprep.mubr.f32.mxu1 %v4522_v54  ;;  %v3470_v24 = vpack.c.bf16 %v4506_v45, %v4501_v18  ;;  %v5053_v18 = vand.u32 4294901760, %v4447_v25  ;;  %v1629_v20 = vand.u32 4294901760, %v4740_v36 }
 0x196   :  { %3439 = vmatprep.subr.bf16.mxu1 %v3438_v1 }
 0x199   :  { %3441 = vmatpush3.bf16.msra.mxu1 %v3438_v1 }
 0x19a   :  { %3443 = vmatprep.subr.bf16.mxu1 %v3442_v0 }
 0x19d   :  { %3445 = vmatpush3.bf16.msra.mxu1 %v3442_v0 }
 0x19e   :  { %3447 = vmatprep.subr.bf16.mxu1 %v3446_v46 }
 0x1a1   :  { %3449 = vmatpush3.bf16.msra.mxu1 %v3446_v46  ;;  %v3478_v46 = vpack.c.bf16 %v4543_v49, %v4538_v30  ;;  %v1630_v30 = vsub.f32 %v4740_v36, %v1629_v20 }
 0x1a2   :  { %3451 = vmatprep.subr.bf16.mxu1 %v4437_v13 }
 0x1a5   :  { %3453 = vmatpush3.bf16.msra.mxu1 %v4437_v13  ;;  %v4586_v13 = vld [vmem:[#allocation8 + $0x8] sm:$0xff] }
 0x1a6   :  { %3455 = vmatprep.subr.bf16.mxu1 %v4451_v58 }
 0x1a9   :  { %3457 = vmatpush3.bf16.msra.mxu1 %v4451_v58  ;;  %v5045_v58 = vand.u32 4294901760, %v4586_v13 }
 0x1aa   :  { %3459 = vmatprep.subr.bf16.mxu1 %v4471_v12 }
 0x1ab   :  { %v4608_v56 = vpack.c.bf16 %v5045_v58, %v1526_v57 }
 0x1ad   :  { %3461 = vmatpush3.bf16.msra.mxu1 %v4471_v12  ;;  %v4597_v12 = vld [vmem:[#allocation8 + $0x20] sm:$0xff]  ;;  %3595 = vmatprep.subr.bf16.mxu0 %v4608_v56 }
 0x1ae   :  { %3463 = vmatprep.subr.bf16.mxu1 %v4473_v44  ;;  %v1538_v38 = vand.u32 4294901760, %v4597_v12  ;;  %3597 = vmatpush3.bf16.msra.mxu0 %v4608_v56 }
 0x1b1   :  { %3465 = vmatpush3.bf16.msra.mxu1 %v4473_v44  ;;  %v4599_v44 = vld [vmem:[#allocation8 + $0x28] sm:$0xff] }
 0x1b2   :  { %3467 = vmatprep.subr.bf16.mxu1 %v4477_v51  ;;  %v1541_v1 = vand.u32 4294901760, %v4599_v44 }
 0x1b4   :  { %2858 = vmatmul.mubr.f32.vlgmr.msra.gmra.mrb[2].mxu1 %v4520_v15 }
 0x1b5   :  { %3469 = vmatpush3.bf16.msra.mxu1 %v4477_v51  ;;  %2892 = vmatprep.mubr.f32.mxu1 %v4546_v62  ;;  %v5043_v51 = vand.u32 4294901760, %v4594_v4  ;;  %v1631_v62 = vand.u32 4294901760, %v1630_v30 }
 0x1b6   :  { %3471 = vmatprep.subr.bf16.mxu1 %v3470_v24 }
 0x1b7   :  { %v4616_v0 = vpack.c.bf16 %v5043_v51, %v5044_v5  ;;  %v4631_v51 = vpack.c.bf16 %v1541_v1, %v1538_v38  ;;  %v1544_v5 = vand.u32 4294901760, %v4618_v6 }
 0x1b9   :  { %3473 = vmatpush3.bf16.msra.mxu1 %v3470_v24  ;;  %3599 = vmatprep.subr.bf16.mxu0 %v4616_v0  ;;  %v1547_v24 = vand.u32 4294901760, %v4620_v37 }
 0x1ba   :  { %3475 = vmatprep.subr.bf16.mxu1 %v3474_v22  ;;  %3601 = vmatpush3.bf16.msra.mxu0 %v4616_v0 }
 0x1bb   :  { %3603 = vmatprep.subr.bf16.mxu0 %v4631_v51  ;;  %v4641_v58 = vpack.c.bf16 %v1547_v24, %v1544_v5 }
 0x1bd   :  { %3477 = vmatpush3.bf16.msra.mxu1 %v3474_v22 }
 0x1be   :  { %3479 = vmatprep.subr.bf16.mxu1 %v3478_v46  ;;  %3605 = vmatpush3.bf16.msra.mxu0 %v4631_v51 }
 0x1bf   :  { %3607 = vmatprep.subr.bf16.mxu0 %v4641_v58 }
 0x1c1   :  { %3481 = vmatpush3.bf16.msra.mxu1 %v3478_v46 }
 0x1c2   :  { %3483 = vmatprep.subr.bf16.mxu1 %v4481_v19  ;;  %3609 = vmatpush3.bf16.msra.mxu0 %v4641_v58 }
 0x1c5   :  { %3485 = vmatpush3.bf16.msra.mxu1 %v4481_v19  ;;  %v3530_v19 = vpack.c.bf16 %v927_v43, %v920_v16  ;;  %v3546_v16 = vpack.c.bf16 %v983_v27, %v976_v33  ;;  %v5051_v43 = vand.u32 4294901760, %v4433_v31  ;;  %v3558_v33 = vpack.c.bf16 %v5055_v32, %v5054_v26 }
 0x1c6   :  { %3487 = vmatprep.subr.bf16.mxu1 %v4485_v21  ;;  %v1559_v31 = vand.u32 4294901760, %v1513_v28 }
 0x1c9   :  { %3489 = vmatpush3.bf16.msra.mxu1 %v4485_v21  ;;  %v3534_v21 = vpack.c.bf16 %v941_v14, %v934_v11  ;;  %v5056_v11 = vand.u32 4294901760, %v4586_v13 }
 0x1ca   :  { %3491 = vmatprep.subr.bf16.mxu1 %v4489_v47 }
 0x1cb   :  { %v4745_v14 = vsub.f32 %v4586_v13, %v5056_v11 }
 0x1cd   :  { %3493 = vmatpush3.bf16.msra.mxu1 %v4489_v47  ;;  %v3550_v47 = vpack.c.bf16 %v5051_v43, %v990_v39  ;;  %v1514_v39 = vld [vmem:[#allocation8 + $0x60] sm:$0xff] }
 0x1ce   :  { %3495 = vmatprep.subr.bf16.mxu1 %v4493_v48 }
 0x1d1   :  { %3497 = vmatpush3.bf16.msra.mxu1 %v4493_v48  ;;  %v5052_v48 = vand.u32 4294901760, %v4445_v23  ;;  %v1562_v23 = vand.u32 4294901760, %v1514_v39 }
 0x1d2   :  { %3499 = vmatprep.subr.bf16.mxu1 %v4343_v59 }
 0x1d3   :  { %v3554_v45 = vpack.c.bf16 %v5053_v18, %v5052_v48  ;;  %v4790_v18 = vsub.f32 %v1514_v39, %v1562_v23 }
 0x1d4   :  { %2893 = vmatmul.mubr.f32.vlgmr.msra.gmra.mrb[2].mxu1 %v4532_v17  ;;  %v1636_v17 = vand.u32 4294901760, %v4745_v14 }
 0x1d5   :  { %3501 = vmatpush3.bf16.msra.mxu1 %v4343_v59  ;;  %2927 = vmatprep.mubr.f32.mxu1 %v899_v2 }
 0x1d6   :  { %3503 = vmatprep.subr.bf16.mxu1 %v4357_v53  ;;  %v1637_v49 = vsub.f32 %v4745_v14, %v1636_v17 }
 0x1d9   :  { %3505 = vmatpush3.bf16.msra.mxu1 %v4357_v53 }
 0x1da   :  { %3507 = vmatprep.subr.bf16.mxu1 %v4373_v60 }
 0x1dd   :  { %3509 = vmatpush3.bf16.msra.mxu1 %v4373_v60 }
 0x1de   :  { %3511 = vmatprep.subr.bf16.mxu1 %v4383_v40 }
 0x1e1   :  { %3513 = vmatpush3.bf16.msra.mxu1 %v4383_v40 }
 0x1e2   :  { %3515 = vmatprep.subr.bf16.mxu1 %v4388_v61 }
 0x1e5   :  { %3517 = vmatpush3.bf16.msra.mxu1 %v4388_v61 }
 0x1e6   :  { %3519 = vmatprep.subr.bf16.mxu1 %v4392_v3 }
 0x1e9   :  { %3521 = vmatpush3.bf16.msra.mxu1 %v4392_v3 }
 0x1ea   :  { %3523 = vmatprep.subr.bf16.mxu1 %v4396_v42 }
 0x1ed   :  { %3525 = vmatpush3.bf16.msra.mxu1 %v4396_v42 }
 0x1ee   :  { %3527 = vmatprep.subr.bf16.mxu1 %v4406_v50 }
 0x1f1   :  { %3529 = vmatpush3.bf16.msra.mxu1 %v4406_v50 }
 0x1f2   :  { %3531 = vmatprep.subr.bf16.mxu1 %v3530_v19 }
 0x1f4   :  { %2928 = vmatmul.mubr.f32.vlgmr.msra.gmra.mrb[2].mxu1 %v909_v41  ;;  %v1638_v41 = vand.u32 4294901760, %v1637_v49 }
 0x1f5   :  { %3533 = vmatpush3.bf16.msra.mxu1 %v3530_v19  ;;  %2962 = vmatprep.mubr.f32.mxu1 %v4522_v54  ;;  %v4778_v19 = vsub.f32 %v1513_v28, %v1559_v31 }
 0x1f6   :  { %3535 = vmatprep.subr.bf16.mxu1 %v3534_v21  ;;  %v4761_v2 = vpack.c.bf16 %v1638_v41, %v1631_v62 }
 0x1f9   :  { %3537 = vmatpush3.bf16.msra.mxu1 %v3534_v21 }
 0x1fa   :  { %3539 = vmatprep.subr.bf16.mxu1 %v3538_v7 }
 0x1fd   :  { %3541 = vmatpush3.bf16.msra.mxu1 %v3538_v7 }
 0x1fe   :  { %3543 = vmatprep.subr.bf16.mxu1 %v3542_v9 }
 0x201   :  { %3545 = vmatpush3.bf16.msra.mxu1 %v3542_v9 }
 0x202   :  { %3547 = vmatprep.subr.bf16.mxu1 %v3546_v16 }
 0x205   :  { %3549 = vmatpush3.bf16.msra.mxu1 %v3546_v16  ;;  %v5050_v16 = vand.u32 4294901760, %v4778_v19 }
 0x206   :  { %3551 = vmatprep.subr.bf16.mxu1 %v3550_v47 }
 0x207   :  { %v1707_v48 = vsub.f32 %v4778_v19, %v5050_v16 }
 0x209   :  { %3553 = vmatpush3.bf16.msra.mxu1 %v3550_v47  ;;  %v1708_v32 = vand.u32 4294901760, %v1707_v48 }
 0x20a   :  { %3555 = vmatprep.subr.bf16.mxu1 %v3554_v45 }
 0x20d   :  { %3557 = vmatpush3.bf16.msra.mxu1 %v3554_v45 }
 0x20e   :  { %3559 = vmatprep.subr.bf16.mxu1 %v3558_v33 }
 0x211   :  { %3561 = vmatpush3.bf16.msra.mxu1 %v3558_v33  ;;  %v5049_v33 = vand.u32 4294901760, %v4790_v18 }
 0x212   :  { %3563 = vmatprep.subr.bf16.mxu1 %v4343_v59 }
 0x214   :  { %2963 = vmatmul.mubr.f32.vlgmr.msra.gmra.mrb[2].mxu1 %v4520_v15 }
 0x215   :  { %3565 = vmatpush3.bf16.msra.mxu1 %v4343_v59  ;;  %2997 = vmatprep.mubr.f32.mxu1 %v4522_v54  ;;  %v1510_v59 = vld [vmem:[#allocation8 + $0x40] sm:$0xff]  ;;  %v1571_v54 = vand.u32 4294901760, %v1517_v55 }
 0x216   :  { %3567 = vmatprep.subr.bf16.mxu1 %v4357_v53 }
 0x219   :  { %3569 = vmatpush3.bf16.msra.mxu1 %v4357_v53  ;;  %v1511_v53 = vld [vmem:[#allocation8 + $0x48] sm:$0xff] }
 0x21a   :  { %3571 = vmatprep.subr.bf16.mxu1 %v4373_v60 }
 0x21d   :  { %3573 = vmatpush3.bf16.msra.mxu1 %v4373_v60  ;;  %v1550_v60 = vand.u32 4294901760, %v1510_v59 }
 0x21e   :  { %3575 = vmatprep.subr.bf16.mxu1 %v4383_v40 }
 0x21f   :  { %v4764_v29 = vsub.f32 %v1510_v59, %v1550_v60 }
 0x221   :  { %3577 = vmatpush3.bf16.msra.mxu1 %v4383_v40  ;;  %v1553_v40 = vand.u32 4294901760, %v1511_v53  ;;  %v1685_v10 = vand.u32 4294901760, %v4764_v29 }
 0x222   :  { %3579 = vmatprep.subr.bf16.mxu1 %v4388_v61 }
 0x223   :  { %v4727_v27 = vpack.c.bf16 %v1553_v40, %v1550_v60  ;;  %v4766_v35 = vsub.f32 %v1511_v53, %v1553_v40  ;;  %v1686_v57 = vsub.f32 %v4764_v29, %v1685_v10  ;;  %v1714_v60 = vsub.f32 %v4790_v18, %v5049_v33 }
 0x225   :  { %3581 = vmatpush3.bf16.msra.mxu1 %v4388_v61  ;;  %v1512_v61 = vld [vmem:[#allocation8 + $0x50] sm:$0xff]  ;;  %3611 = vmatprep.subr.bf16.mxu0 %v4727_v27  ;;  %v1692_v13 = vand.u32 4294901760, %v4766_v35  ;;  %v1687_v21 = vand.u32 4294901760, %v1686_v57  ;;  %v4826_v30 = vpack.c.bf16 %v4766_v35, %v4764_v29 }
 0x226   :  { %3583 = vmatprep.subr.bf16.mxu1 %v4392_v3  ;;  %3613 = vmatpush3.bf16.msra.mxu0 %v4727_v27  ;;  %v2254_v57 = vld [vmem:[%s5034_s4] ss:$0 sm:$0xff] }
 0x227   :  { %v1693_v22 = vsub.f32 %v4766_v35, %v1692_v13 }
 0x229   :  { %3585 = vmatpush3.bf16.msra.mxu1 %v4392_v3  ;;  %v1556_v3 = vand.u32 4294901760, %v1512_v61  ;;  %v1694_v7 = vand.u32 4294901760, %v1693_v22  ;;  %v5057_v22 = vand.u32 4294901760, %v4588_v52 }
 0x22a   :  { %3587 = vmatprep.subr.bf16.mxu1 %v4396_v42 }
 0x22b   :  { %v4776_v46 = vsub.f32 %v1512_v61, %v1556_v3  ;;  %v4782_v43 = vpack.c.bf16 %v1694_v7, %v1687_v21  ;;  %v4803_v61 = vsub.f32 %v1517_v55, %v1571_v54  ;;  %v4846_v21 = vsub.f32 %v4588_v52, %v5057_v22 }
 0x22c   :  { %v5058_v7 = vand.u32 4294901760, %v4594_v4  ;;  %v4888_v22 = vsub.f32 %v4620_v37, %v1547_v24 }
 0x22d   :  { %3589 = vmatpush3.bf16.msra.mxu1 %v4396_v42  ;;  %v4731_v42 = vpack.c.bf16 %v1559_v31, %v1556_v3  ;;  %v1699_v9 = vand.u32 4294901760, %v4776_v46  ;;  %v1715_v3 = vand.u32 4294901760, %v1714_v60  ;;  %v5046_v39 = vand.u32 4294901760, %v4803_v61 }
 0x22e   :  { %3591 = vmatprep.subr.bf16.mxu1 %v4406_v50  ;;  %v4830_v49 = vpack.c.bf16 %v4778_v19, %v4776_v46  ;;  %v1678_v24 = vand.u32 4294901760, %v4888_v22  ;;  %v5063_v35 = vand.u32 4294901760, %v4803_v61 }
 0x22f   :  { %3615 = vmatprep.subr.bf16.mxu0 %v4731_v42  ;;  %v1700_v47 = vsub.f32 %v4776_v46, %v1699_v9 }
 0x230   :  { %3617 = vmatpush3.bf16.msra.mxu0 %v4731_v42  ;;  %v1679_v16 = vsub.f32 %v4888_v22, %v1678_v24 }
 0x231   :  { %3593 = vmatpush3.bf16.msra.mxu1 %v4406_v50  ;;  %v1515_v50 = vld [vmem:[#allocation8 + $0x68] sm:$0xff]  ;;  %v1701_v26 = vand.u32 4294901760, %v1700_v47  ;;  %v4851_v47 = vsub.f32 %v4594_v4, %v5058_v7 }
 0x232   :  { %v1565_v25 = vand.u32 4294901760, %v1515_v50 }
 0x233   :  { %v4796_v53 = vpack.c.bf16 %v1708_v32, %v1701_v26 }
 0x234   :  { %2998 = vmatmul.mubr.f32.vlgmr.msra.gmra.mrb[2].mxu1 %v4520_v15  ;;  %v4735_v63 = vpack.c.bf16 %v1565_v25, %v1562_v23  ;;  %v1568_v15 = vand.u32 4294901760, %v1516_v34  ;;  %v4792_v45 = vsub.f32 %v1515_v50, %v1565_v25  ;;  %v1735_v25 = vsub.f32 %v4803_v61, %v5046_v39 }
 0x236   :  { %3619 = vmatprep.subr.bf16.mxu0 %v4735_v63  ;;  %v4751_v8 = vpack.c.bf16 %v1571_v54, %v1568_v15  ;;  %v5048_v59 = vand.u32 4294901760, %v4792_v45  ;;  %v4801_v40 = vsub.f32 %v1516_v34, %v1568_v15  ;;  %v1736_v55 = vand.u32 4294901760, %v1735_v25 }
 0x237   :  { %3621 = vmatpush3.bf16.msra.mxu0 %v4735_v63  ;;  %v4822_v54 = vpack.c.bf16 %v4745_v14, %v4740_v36  ;;  %v4834_v62 = vpack.c.bf16 %v4792_v45, %v4790_v18 }
 0x238   :  { %3623 = vmatprep.subr.bf16.mxu0 %v4751_v8  ;;  %v1721_v28 = vsub.f32 %v4792_v45, %v5048_v59  ;;  %v5047_v31 = vand.u32 4294901760, %v4801_v40  ;;  %v4838_v41 = vpack.c.bf16 %v4803_v61, %v4801_v40  ;;  %v5062_v29 = vand.u32 4294901760, %v4801_v40 }
 0x23a   :  { %v1722_v50 = vand.u32 4294901760, %v1721_v28  ;;  %v1728_v23 = vsub.f32 %v4801_v40, %v5047_v31  ;;  %v1643_v28 = vand.u32 4294901760, %v4846_v21 }
 0x23b   :  { %3625 = vmatpush3.bf16.msra.mxu0 %v4751_v8 }
 0x23c   :  { %3627 = vmatprep.subr.bf16.mxu0 %v4761_v2  ;;  %v4816_v11 = vpack.c.bf16 %v1722_v50, %v1715_v3  ;;  %v1729_v34 = vand.u32 4294901760, %v1728_v23  ;;  %v1650_v3 = vand.u32 4294901760, %v4851_v47  ;;  %v4858_v50 = vsub.f32 %v4597_v12, %v1538_v38 }
 0x23d   :  { %v4863_v23 = vsub.f32 %v4599_v44, %v1541_v1  ;;  %v4883_v1 = vsub.f32 %v4618_v6, %v1544_v5 }
 0x23e   :  { %v4818_v15 = vpack.c.bf16 %v1736_v55, %v1729_v34  ;;  %v1644_v55 = vsub.f32 %v4846_v21, %v1643_v28  ;;  %v1651_v12 = vsub.f32 %v4851_v47, %v1650_v3  ;;  %v1657_v38 = vand.u32 4294901760, %v4858_v50 }
 0x23f   :  { %v1664_v44 = vand.u32 4294901760, %v4863_v23  ;;  %v1671_v37 = vand.u32 4294901760, %v4883_v1 }
 0x241   :  { %v1665_v6 = vsub.f32 %v4863_v23, %v1664_v44  ;;  %v1672_v33 = vsub.f32 %v4883_v1, %v1671_v37  ;;  %v3730_v36 = vpack.c.bf16 %v1664_v44, %v1657_v38  ;;  %v3734_v14 = vpack.c.bf16 %v1678_v24, %v1671_v37 }
 0x243   :  { %v1666_v59 = vand.u32 4294901760, %v1665_v6 }
 0x307   :  { %v2999_v48 = vpop.f32.mrb[2].mxu1 }
 0x308   :  { %v3790_v26 = vadd.f32 %v2999_v48, %v2254_v57  ;;  %v1490_v32 = vpop.f32.mrb[3].mxu1 }
 0x309   :  { %v3791_v60 = vadd.f32 %v2254_v57, %v1490_v32  ;;  %v1645_v32 = vand.u32 4294901760, %v1644_v55 }
 0x30a   :  { %v1501_v52 = vmax.f32 %v3790_v26, 0.0 }
 0x30b   :  { %v1500_v4 = vmax.f32 %v3791_v60, 0.0  ;;  %v1652_v60 = vand.u32 4294901760, %v1651_v12 }
 0x30c   :  { %v4865_v25 = vand.u32 4294901760, %v1501_v52 }
 0x30d   :  { %v4867_v34 = vand.u32 4294901760, %v1500_v4  ;;  %v3630_v12 = vpack.c.bf16 %v1652_v60, %v1645_v32  ;;  %v1673_v32 = vand.u32 4294901760, %v1672_v33  ;;  %v1680_v60 = vand.u32 4294901760, %v1679_v16 }
 0x30e   :  { %v4877_v57 = vsub.f32 %v1501_v52, %v4865_v25  ;;  %v1658_v52 = vsub.f32 %v4858_v50, %v1657_v38  ;;  %v3666_v16 = vpack.c.bf16 %v4863_v23, %v4858_v50  ;;  %v3722_v33 = vpack.c.bf16 %v1636_v17, %v1629_v20 }
 0x30f   :  { %v4891_v7 = vsub.f32 %v1500_v4, %v4867_v34  ;;  %v3738_v20 = vpack.c.bf16 %v1692_v13, %v1685_v10  ;;  %v5059_v17 = vand.u32 4294901760, %v4778_v19  ;;  %v3750_v10 = vpack.c.bf16 %v5063_v35, %v5062_v29 }
 0x310   :  { %v1618_v48 = vand.u32 4294901760, %v4877_v57  ;;  %v1659_v39 = vand.u32 4294901760, %v1658_v52  ;;  %v3638_v52 = vpack.c.bf16 %v1680_v60, %v1673_v32 }
 0x311   :  { %v1608_v26 = vand.u32 4294901760, %v4891_v7 }
 0x312   :  { %v1619_v5 = vsub.f32 %v4877_v57, %v1618_v48 }
 0x313   :  { %v1609_v4 = vsub.f32 %v4891_v7, %v1608_v26 }
 0x314   :  { %v1620_v31 = vand.u32 4294901760, %v1619_v5 }
 0x315   :  { %v1610_v55 = vand.u32 4294901760, %v1609_v4  ;;  %v3634_v4 = vpack.c.bf16 %v1666_v59, %v1659_v39  ;;  %v3726_v59 = vpack.c.bf16 %v1650_v3, %v1643_v28  ;;  %v5061_v39 = vand.u32 4294901760, %v4792_v45 }
 0x317   :  { %3032 = vmatprep.mubr.f32.mxu0 %v1610_v55 }
 0x318   :  { %3033 = vmatmul.mubr.f32.vlgmr.msra.gmra.mrb[2].mxu0 %v1620_v31  ;;  %v5060_v31 = vand.u32 4294901760, %v4790_v18 }
 0x319   :  { %3629 = vmatpush3.bf16.msra.mxu0 %v4761_v2  ;;  %3067 = vmatprep.mubr.f32.mxu0 %v4867_v34  ;;  %v3662_v2 = vpack.c.bf16 %v4851_v47, %v4846_v21 }
 0x31a   :  { %3631 = vmatprep.subr.bf16.mxu0 %v3630_v12 }
 0x31d   :  { %3633 = vmatpush3.bf16.msra.mxu0 %v3630_v12 }
 0x31e   :  { %3635 = vmatprep.subr.bf16.mxu0 %v3634_v4 }
 0x321   :  { %3637 = vmatpush3.bf16.msra.mxu0 %v3634_v4 }
 0x322   :  { %3639 = vmatprep.subr.bf16.mxu0 %v3638_v52 }
 0x325   :  { %3641 = vmatpush3.bf16.msra.mxu0 %v3638_v52 }
 0x326   :  { %3643 = vmatprep.subr.bf16.mxu0 %v4782_v43 }
 0x329   :  { %3645 = vmatpush3.bf16.msra.mxu0 %v4782_v43  ;;  %v3670_v43 = vpack.c.bf16 %v4888_v22, %v4883_v1 }
 0x32a   :  { %3647 = vmatprep.subr.bf16.mxu0 %v4796_v53 }
 0x32d   :  { %3649 = vmatpush3.bf16.msra.mxu0 %v4796_v53  ;;  %v3742_v53 = vpack.c.bf16 %v5059_v17, %v1699_v9 }
 0x32e   :  { %3651 = vmatprep.subr.bf16.mxu0 %v4816_v11 }
 0x331   :  { %3653 = vmatpush3.bf16.msra.mxu0 %v4816_v11  ;;  %v3746_v11 = vpack.c.bf16 %v5061_v39, %v5060_v31 }
 0x332   :  { %3655 = vmatprep.subr.bf16.mxu0 %v4818_v15 }
 0x335   :  { %3657 = vmatpush3.bf16.msra.mxu0 %v4818_v15 }
 0x336   :  { %3659 = vmatprep.subr.bf16.mxu0 %v4822_v54 }
 0x338   :  { %3068 = vmatmul.mubr.f32.vlgmr.msra.gmra.mrb[2].mxu0 %v4865_v25 }
 0x339   :  { %3661 = vmatpush3.bf16.msra.mxu0 %v4822_v54  ;;  %3102 = vmatprep.mubr.f32.mxu0 %v4891_v7 }
 0x33a   :  { %3663 = vmatprep.subr.bf16.mxu0 %v3662_v2 }
 0x33d   :  { %3665 = vmatpush3.bf16.msra.mxu0 %v3662_v2 }
 0x33e   :  { %3667 = vmatprep.subr.bf16.mxu0 %v3666_v16 }
 0x341   :  { %3669 = vmatpush3.bf16.msra.mxu0 %v3666_v16 }
 0x342   :  { %3671 = vmatprep.subr.bf16.mxu0 %v3670_v43 }
 0x345   :  { %3673 = vmatpush3.bf16.msra.mxu0 %v3670_v43 }
 0x346   :  { %3675 = vmatprep.subr.bf16.mxu0 %v4826_v30 }
 0x349   :  { %3677 = vmatpush3.bf16.msra.mxu0 %v4826_v30 }
 0x34a   :  { %3679 = vmatprep.subr.bf16.mxu0 %v4830_v49 }
 0x34d   :  { %3681 = vmatpush3.bf16.msra.mxu0 %v4830_v49 }
 0x34e   :  { %3683 = vmatprep.subr.bf16.mxu0 %v4834_v62 }
 0x351   :  { %3685 = vmatpush3.bf16.msra.mxu0 %v4834_v62 }
 0x352   :  { %3687 = vmatprep.subr.bf16.mxu0 %v4838_v41 }
 0x355   :  { %3689 = vmatpush3.bf16.msra.mxu0 %v4838_v41 }
 0x356   :  { %3691 = vmatprep.subr.bf16.mxu0 %v4608_v56 }
 0x358   :  { %3103 = vmatmul.mubr.f32.vlgmr.msra.gmra.mrb[2].mxu0 %v4877_v57 }
 0x359   :  { %3693 = vmatpush3.bf16.msra.mxu0 %v4608_v56  ;;  %3137 = vmatprep.mubr.f32.mxu0 %v1608_v26 }
 0x35a   :  { %3695 = vmatprep.subr.bf16.mxu0 %v4616_v0 }
 0x35d   :  { %3697 = vmatpush3.bf16.msra.mxu0 %v4616_v0 }
 0x35e   :  { %3699 = vmatprep.subr.bf16.mxu0 %v4631_v51 }
 0x361   :  { %3701 = vmatpush3.bf16.msra.mxu0 %v4631_v51 }
 0x362   :  { %3703 = vmatprep.subr.bf16.mxu0 %v4641_v58 }
 0x365   :  { %3705 = vmatpush3.bf16.msra.mxu0 %v4641_v58 }
 0x366   :  { %3707 = vmatprep.subr.bf16.mxu0 %v4727_v27 }
 0x369   :  { %3709 = vmatpush3.bf16.msra.mxu0 %v4727_v27 }
 0x36a   :  { %3711 = vmatprep.subr.bf16.mxu0 %v4731_v42 }
 0x36d   :  { %3713 = vmatpush3.bf16.msra.mxu0 %v4731_v42 }
 0x36e   :  { %3715 = vmatprep.subr.bf16.mxu0 %v4735_v63 }
 0x371   :  { %3717 = vmatpush3.bf16.msra.mxu0 %v4735_v63 }
 0x372   :  { %3719 = vmatprep.subr.bf16.mxu0 %v4751_v8 }
 0x375   :  { %3721 = vmatpush3.bf16.msra.mxu0 %v4751_v8 }
 0x376   :  { %3723 = vmatprep.subr.bf16.mxu0 %v3722_v33 }
 0x378   :  { %3138 = vmatmul.mubr.f32.vlgmr.msra.gmra.mrb[2].mxu0 %v1618_v48 }
 0x379   :  { %3725 = vmatpush3.bf16.msra.mxu0 %v3722_v33  ;;  %3172 = vmatprep.mubr.f32.mxu0 %v4867_v34 }
 0x37a   :  { %3727 = vmatprep.subr.bf16.mxu0 %v3726_v59 }
 0x37d   :  { %3729 = vmatpush3.bf16.msra.mxu0 %v3726_v59 }
 0x37e   :  { %3731 = vmatprep.subr.bf16.mxu0 %v3730_v36 }
 0x381   :  { %3733 = vmatpush3.bf16.msra.mxu0 %v3730_v36 }
 0x382   :  { %3735 = vmatprep.subr.bf16.mxu0 %v3734_v14 }
 0x385   :  { %3737 = vmatpush3.bf16.msra.mxu0 %v3734_v14 }
 0x386   :  { %3739 = vmatprep.subr.bf16.mxu0 %v3738_v20 }
 0x389   :  { %3741 = vmatpush3.bf16.msra.mxu0 %v3738_v20 }
 0x38a   :  { %3743 = vmatprep.subr.bf16.mxu0 %v3742_v53 }
 0x38d   :  { %3745 = vmatpush3.bf16.msra.mxu0 %v3742_v53 }
 0x38e   :  { %3747 = vmatprep.subr.bf16.mxu0 %v3746_v11 }
 0x391   :  { %3749 = vmatpush3.bf16.msra.mxu0 %v3746_v11 }
 0x392   :  { %3751 = vmatprep.subr.bf16.mxu0 %v3750_v10 }
 0x395   :  { %3753 = vmatpush3.bf16.msra.mxu0 %v3750_v10 }
 0x396   :  { %3755 = vmatprep.subr.bf16.mxu0 %v4608_v56 }
 0x398   :  { %3173 = vmatmul.mubr.f32.vlgmr.msra.gmra.mrb[2].mxu0 %v4865_v25 }
 0x399   :  { %3757 = vmatpush3.bf16.msra.mxu0 %v4608_v56  ;;  %3207 = vmatprep.mubr.f32.mxu0 %v4867_v34  ;;  %v2255_v56 = vld [vmem:[%s5036_s6] ss:$0 sm:$0xff]  ;;  %s3961_s6 = smov [#allocation10]  }
 0x39a   :  { %3759 = vmatprep.subr.bf16.mxu0 %v4616_v0  ;;  %s2239_s30 = sshll.u32 %s3961_s6, 4  ;;  %s2240_s30 = int_to_ptr.vmem [resolvable:$true] %s2239_s30 }
 0x39b   :  { %s3925_s8 = scalar_lea.vmem %s2240_s30, 256  ;;  %p3930_p5 = scmp.lt.s32.totalorder %s2240_s30, %s2240_s30 }
 0x39c   :  { %p3926_p4 = scmp.ne.s32.totalorder %s2240_s30, %s3925_s8  ;;  %p3931_p6 = scmp.lt.s32.totalorder %s3925_s8, %s3925_s8 }
 0x39d   :  { %3761 = vmatpush3.bf16.msra.mxu0 %v4616_v0 }
 0x39e   :  { %3763 = vmatprep.subr.bf16.mxu0 %v4631_v51  ;;  %p3932_p7 = por %p3931_p6, %p3930_p5 }
 0x3a0   :  { %p3933_p8 = pnand %p3932_p7, %p3926_p4 }
 0x3a1   :  { %3765 = vmatpush3.bf16.msra.mxu0 %v4631_v51  ;;  %v2209_v51 = vlaneseq }
 0x3a2   :  { %3767 = vmatprep.subr.bf16.mxu0 %v4641_v58 }
 0x3a5   :  { %3769 = vmatpush3.bf16.msra.mxu0 %v4641_v58  ;;  %v2210_v58 = vand.u32 127, %v2209_v51 }
 0x3a6   :  { %3771 = vmatprep.subr.bf16.mxu0 %v4727_v27 }
 0x3a7   :  { %vm2211_vm0 = vcmp.lt.s32.totalorder %v2210_v58, 16 }
 0x3a9   :  { %3773 = vmatpush3.bf16.msra.mxu0 %v4727_v27 }
 0x3aa   :  { %3775 = vmatprep.subr.bf16.mxu0 %v4731_v42 }
 0x3ad   :  { %3777 = vmatpush3.bf16.msra.mxu0 %v4731_v42 }
 0x3ae   :  { %3779 = vmatprep.subr.bf16.mxu0 %v4735_v63 }
 0x3b1   :  { %3781 = vmatpush3.bf16.msra.mxu0 %v4735_v63 }
 0x3b2   :  { %3783 = vmatprep.subr.bf16.mxu0 %v4751_v8 }
 0x3b5   :  { %3785 = vmatpush3.bf16.msra.mxu0 %v4751_v8 }
 0x3b8   :  { %3208 = vmatmul.mubr.f32.vlgmr.msra.gmra.mrb[2].mxu0 %v4865_v25 }
 0x48b   :  { %v3209_v0 = vpop.f32.mrb[2].mxu0 }
 0x48c   :  { %v2199_v27 = vpop.f32.mrb[3].mxu0  ;;  %v3792_v13 = vadd.f32 %v3209_v0, %v2255_v56 }
 0x48d   :  { %v3793_v42 = vadd.f32 %v2255_v56, %v2199_v27 }
 0x48e   :  { %v2213_v63 = vsel %vm2211_vm0, %v3792_v13, -inf }
 0x48f   :  { %v2212_v46 = vsel %vm2211_vm0, %v3793_v42, -inf }
 0x490   :  { %2214 = vmax.xlane.f32.xlu0 %v2212_v46 }
 0x494   :  { %2216 = vmax.xlane.f32.xlu0 %v2213_v63 }
 0x51d   :  { %v2215_v19 = vpop.xlane.xlu0 %2214 }
 0x51e   :  { %v2218_v9 = vsub.f32 %v2212_v46, %v2215_v19 }
 0x520   :  { %v2220_v8 = vmul.f32 1.442695, %v2218_v9 }
 0x521   :  { %v2217_v18 = vpop.xlane.xlu0 %2216 }
 0x522   :  { %3829 = vpow2.f32 %v2220_v8  ;;  %v2219_v45 = vsub.f32 %v2213_v63, %v2217_v18 }
 0x524   :  { %v2222_v40 = vmul.f32 1.442695, %v2219_v45 }
 0x526   :  { %3831 = vpow2.f32 %v2222_v40 }
 0x52c   :  { %v3830_v61 = vpop.eup %3829 }
 0x52d   :  { %2224 = vadd.xlane.f32.xlu1 %v3830_v61 }
 0x530   :  { %v3832_v15 = vpop.eup %3831 }
 0x531   :  { %2226 = vadd.xlane.f32.xlu1 %v3832_v15 }
 0x5ba   :  { %v2225_v54 = vpop.xlane.xlu1 %2224 }
 0x5bb   :  { %3833 = vrcp.f32 %v2225_v54 }
 0x5be   :  { %v2227_v30 = vpop.xlane.xlu1 %2226 }
 0x5bf   :  { %3835 = vrcp.f32 %v2227_v30 }
 0x5c5   :  { %v3834_v49 = vpop.eup %3833 }
 0x5c6   :  { %v2229_v62 = vmul.f32 %v3834_v49, %v3830_v61 }
 0x5c8   :  { %2232 = vst [vmem:[#allocation10] sm:$0xff] %v2229_v62 }
 0x5c9   :  { %v3836_v41 = vpop.eup %3835 }
 0x5ca   :  { %v2231_v21 = vmul.f32 %v3836_v41, %v3832_v15 }
 0x5cc   :  { %2233 = vst [vmem:[#allocation10 + $0x8] sm:$0xff] %v2231_v21 }
 0x5cd   :  { %3936 = shalt.err (!%p3933_p8)
}
 0x5ce   :  { %s3937_s11 = scalar_lea.hbm %s5037_s7, 256 }
 0x5cf   :  { %p3938_p9 = scmp.ne.s32.totalorder %s5037_s7, %s3937_s11  ;;  %p3941_p10 = scmp.lt.u32.totalorder %s3937_s11, %s5037_s7 }
 0x5d1   :  { %p3943_p11 = pnand %p3941_p10, %p3938_p9 }
 0x5d3   :  { %3946 = shalt.err (!%p3943_p11)
}
 0x5d4   :  { %2245 = dma.vmem_to_hbm [thread:$0]  %s2240_s30, 256, %s5037_s7, [#allocation4], %s3957_s13, %s3957_s13, %s3958_s14  }
 0x5d5   :  { %3953 = dma.done.wait [#allocation4], 256  }
 0x5d6   :  { %3954 = vsyncadd [#allocation4], 4294967040 }
 0x5d7   :  { %2249 = vsyncpa [#allocation3], 1 }
 0x5d8   :  { %2250 = vsyncpa [#allocation6], 1 }
 0x5d9   :  { %2251 = vsyncpa [#allocation9], 1 }
 0x5da   :  { %2252 = vsyncpa [#allocation4], 1 }

</bundles_post_ra>
